<compile_context>
chip_gen: v5e
topology: v5e:2x2
jax: 0.10.0
libtpu: 0.0.40
codegen_flags: <defaults>
</compile_context>

<pallas_src>
import functools
import jax
import jax.numpy as jnp
from jax.experimental import pallas as pl
from jax.experimental.pallas import tpu as pltpu


# ------------------------------ helpers ------------------------------------ #

def _tile(dim, prefs=(512, 256, 128)):
    """Largest preferred (128-multiple) tile that divides `dim`, else the whole dim."""
    for p in prefs:
        if dim % p == 0:
            return p
    return dim


def _gelu(x):
    # tanh-approx GELU (runs on the EUP slot); HF BERT uses erf-gelu — tiny numeric drift.
    c = jnp.float32(0.7978845608028654)  # sqrt(2/pi)
    return 0.5 * x * (1.0 + jnp.tanh(c * (x + 0.044715 * x * x * x)))


# ------------------------- tiled matmul (+bias/act) ------------------------- #

def _mm_bias_act_kernel(x_ref, w_ref, b_ref, o_ref, acc_ref, *, activation):
    k = pl.program_id(2)

    @pl.when(k == 0)
    def _():
        acc_ref[...] = jnp.zeros_like(acc_ref)

    acc_ref[...] += jnp.dot(x_ref[...], w_ref[...],
                            preferred_element_type=jnp.float32)

    @pl.when(k == pl.num_programs(2) - 1)
    def _():
        y = acc_ref[...] + b_ref[...]
        if activation == "gelu":
            y = _gelu(y)
        o_ref[...] = y.astype(o_ref.dtype)


def matmul_bias_act(x, w, b, activation=None, out_dtype=jnp.bfloat16):
    """y = act(x @ w + b).  x:(M,K) bf16, w:(K,N) bf16, b:(N,) f32."""
    M, K = x.shape
    N = w.shape[1]
    tm, tn, tk = _tile(M), _tile(N), _tile(K)
    cost = pl.CostEstimate(
        flops=2 * M * N * K, transcendentals=0,
        bytes_accessed=M * K * x.dtype.itemsize + K * N * w.dtype.itemsize
        + M * N * jnp.dtype(out_dtype).itemsize)
    return pl.pallas_call(
        functools.partial(_mm_bias_act_kernel, activation=activation),
        out_shape=jax.ShapeDtypeStruct((M, N), out_dtype),
        grid=(M // tm, N // tn, K // tk),
        in_specs=[
            pl.BlockSpec((tm, tk), lambda i, j, k: (i, k)),
            pl.BlockSpec((tk, tn), lambda i, j, k: (k, j)),
            pl.BlockSpec((1, tn), lambda i, j, k: (0, j)),
        ],
        out_specs=pl.BlockSpec((tm, tn), lambda i, j, k: (i, j)),
        scratch_shapes=[pltpu.VMEM((tm, tn), jnp.float32)],
        compiler_params=pltpu.CompilerParams(
            dimension_semantics=("parallel", "parallel", "arbitrary")),
        cost_estimate=cost,
    )(x, w, b.reshape(1, N).astype(jnp.float32))


# ---------------- tiled matmul + residual + LayerNorm epilogue --------------- #

def _mm_res_ln_kernel(x_ref, w_ref, b_ref, r_ref, g_ref, be_ref, o_ref, acc_ref):
    k = pl.program_id(1)

    @pl.when(k == 0)
    def _():
        acc_ref[...] = jnp.zeros_like(acc_ref)

    acc_ref[...] += jnp.dot(x_ref[...], w_ref[...],
                            preferred_element_type=jnp.float32)

    @pl.when(k == pl.num_programs(1) - 1)
    def _():
        y = acc_ref[...] + b_ref[...] + r_ref[...]
        mu = jnp.mean(y, axis=-1, keepdims=True)
        var = jnp.mean((y - mu) * (y - mu), axis=-1, keepdims=True)
        yn = (y - mu) * jax.lax.rsqrt(var + 1e-12)
        o_ref[...] = (yn * g_ref[...] + be_ref[...]).astype(o_ref.dtype)


def matmul_residual_ln(x, w, b, residual, gamma, beta):
    """LayerNorm(residual + x @ w + b).  N = full hidden dim (LN needs the whole row)."""
    M, K = x.shape
    N = w.shape[1]
    tm, tk = _tile(M), _tile(K)
    cost = pl.CostEstimate(
        flops=2 * M * N * K + 10 * M * N, transcendentals=M,
        bytes_accessed=M * K * x.dtype.itemsize + K * N * w.dtype.itemsize + 2 * M * N * 4)
    return pl.pallas_call(
        _mm_res_ln_kernel,
        out_shape=jax.ShapeDtypeStruct((M, N), jnp.float32),
        grid=(M // tm, K // tk),
        in_specs=[
            pl.BlockSpec((tm, tk), lambda i, k: (i, k)),
            pl.BlockSpec((tk, N), lambda i, k: (k, 0)),
            pl.BlockSpec((1, N), lambda i, k: (0, 0)),
            pl.BlockSpec((tm, N), lambda i, k: (i, 0)),
            pl.BlockSpec((1, N), lambda i, k: (0, 0)),
            pl.BlockSpec((1, N), lambda i, k: (0, 0)),
        ],
        out_specs=pl.BlockSpec((tm, N), lambda i, k: (i, 0)),
        scratch_shapes=[pltpu.VMEM((tm, N), jnp.float32)],
        compiler_params=pltpu.CompilerParams(
            dimension_semantics=("parallel", "arbitrary")),
        cost_estimate=cost,
    )(x, w, b.reshape(1, N).astype(jnp.float32),
      residual.astype(jnp.float32), gamma.reshape(1, N), beta.reshape(1, N))


# ------------------------- standalone LayerNorm (embeddings) ----------------- #

def _ln_kernel(x_ref, g_ref, b_ref, o_ref):
    x = x_ref[...]
    mu = jnp.mean(x, axis=-1, keepdims=True)
    var = jnp.mean((x - mu) * (x - mu), axis=-1, keepdims=True)
    y = (x - mu) * jax.lax.rsqrt(var + 1e-12)
    o_ref[...] = (y * g_ref[...] + b_ref[...]).astype(o_ref.dtype)


def layernorm(x, gamma, beta):
    M, H = x.shape
    tm = _tile(M)
    return pl.pallas_call(
        _ln_kernel,
        out_shape=jax.ShapeDtypeStruct((M, H), jnp.float32),
        grid=(M // tm,),
        in_specs=[
            pl.BlockSpec((tm, H), lambda i: (i, 0)),
            pl.BlockSpec((1, H), lambda i: (0, 0)),
            pl.BlockSpec((1, H), lambda i: (0, 0)),
        ],
        out_specs=pl.BlockSpec((tm, H), lambda i: (i, 0)),
        compiler_params=pltpu.CompilerParams(dimension_semantics=("parallel",)),
    )(x.astype(jnp.float32), gamma.reshape(1, H), beta.reshape(1, H))


# ----------------------------- flash attention ------------------------------ #

def _flash_kernel(q_ref, k_ref, v_ref, mask_ref, o_ref, m_sc, l_sc, acc_sc, *, scale):
    kv = pl.program_id(2)

    @pl.when(kv == 0)
    def _():
        m_sc[...] = jnp.full_like(m_sc, -1e30)
        l_sc[...] = jnp.zeros_like(l_sc)
        acc_sc[...] = jnp.zeros_like(acc_sc)

    s = jnp.einsum("bqd,bkd->bqk", q_ref[...], k_ref[...],
                   preferred_element_type=jnp.float32) * scale
    s = s + mask_ref[...]                               # (tb,1,tk) broadcast over queries
    m_new = jnp.maximum(m_sc[...], jnp.max(s, axis=-1, keepdims=True))
    a = jnp.exp(m_sc[...] - m_new)
    p = jnp.exp(s - m_new)
    l_sc[...] = a * l_sc[...] + jnp.sum(p, axis=-1, keepdims=True)
    acc_sc[...] = a * acc_sc[...] + jnp.einsum(
        "bqk,bkd->bqd", p.astype(v_ref.dtype), v_ref[...],
        preferred_element_type=jnp.float32)
    m_sc[...] = m_new

    @pl.when(kv == pl.num_programs(2) - 1)
    def _():
        o_ref[...] = (acc_sc[...] *
                      pl.reciprocal(l_sc[...], approx=True)).astype(o_ref.dtype)


def flash_attention(q, k, v, mask_add):
    """q/k/v: (BH, S, Dh) bf16, mask_add: (BH, 1, S) f32 -> (BH, S, Dh) bf16."""
    BH, S, Dh = q.shape
    scale = 1.0 / float(Dh) ** 0.5
    tb = 8 if BH % 8 == 0 else BH
    tq = _tile(S, (128,))
    tkv = _tile(S, (128,))
    cost = pl.CostEstimate(
        flops=4 * BH * S * S * Dh, transcendentals=BH * S * S,
        bytes_accessed=3 * BH * S * Dh * q.dtype.itemsize + BH * S * Dh * 2 + BH * S * 4)
    return pl.pallas_call(
        functools.partial(_flash_kernel, scale=scale),
        out_shape=jax.ShapeDtypeStruct((BH, S, Dh), jnp.bfloat16),
        grid=(BH // tb, S // tq, S // tkv),
        in_specs=[
            pl.BlockSpec((tb, tq, Dh), lambda b, qi, ki: (b, qi, 0)),
            pl.BlockSpec((tb, tkv, Dh), lambda b, qi, ki: (b, ki, 0)),
            pl.BlockSpec((tb, tkv, Dh), lambda b, qi, ki: (b, ki, 0)),
            pl.BlockSpec((tb, 1, tkv), lambda b, qi, ki: (b, 0, ki)),
        ],
        out_specs=pl.BlockSpec((tb, tq, Dh), lambda b, qi, ki: (b, qi, 0)),
        scratch_shapes=[
            pltpu.VMEM((tb, tq, 1), jnp.float32),
            pltpu.VMEM((tb, tq, 1), jnp.float32),
            pltpu.VMEM((tb, tq, Dh), jnp.float32),
        ],
        compiler_params=pltpu.CompilerParams(
            dimension_semantics=("parallel", "parallel", "arbitrary")),
        cost_estimate=cost,
    )(q, k, v, mask_add)


# ------------------------------ classifier head ------------------------------ #

def _head_kernel(x_ref, w1_ref, b1_ref, w2_ref, b2_ref, o_ref):
    h = jnp.dot(x_ref[...], w1_ref[...], preferred_element_type=jnp.float32) + b1_ref[...]
    # nn.Dropout is the identity at inference.
    y = jnp.dot(h.astype(w2_ref.dtype), w2_ref[...],
                preferred_element_type=jnp.float32) + b2_ref[...]
    o_ref[...] = y.astype(o_ref.dtype)


def classifier_head(pooled, w1, b1, w2p, b2p):
    """Linear(H,H) -> Dropout(identity) -> Linear(H,128-padded).  Tiny: one block."""
    B, H = pooled.shape
    NPAD = w2p.shape[1]
    return pl.pallas_call(
        _head_kernel,
        out_shape=jax.ShapeDtypeStruct((B, NPAD), jnp.float32),
        grid=(1,),
        in_specs=[
            pl.BlockSpec((B, H), lambda i: (0, 0)),
            pl.BlockSpec((H, H), lambda i: (0, 0)),
            pl.BlockSpec((1, H), lambda i: (0, 0)),
            pl.BlockSpec((H, NPAD), lambda i: (0, 0)),
            pl.BlockSpec((1, NPAD), lambda i: (0, 0)),
        ],
        out_specs=pl.BlockSpec((B, NPAD), lambda i: (0, 0)),
    )(pooled.astype(jnp.bfloat16), w1, b1.reshape(1, H).astype(jnp.float32),
      w2p, b2p.reshape(1, NPAD).astype(jnp.float32))


# --------------------------- parameter synthesis ---------------------------- #

def init_params(key, cfg):
    H, I = cfg["hidden"], cfg["intermediate"]
    V, P, T, L = cfg["vocab"], cfg["max_pos"], cfg["type_vocab"], cfg["layers"]
    keys = iter(jax.random.split(key, 8 + 8 * L))

    def nrm(shape, scale=0.02):
        return (scale * jax.random.normal(next(keys), shape)).astype(jnp.float32)

    params = {
        "word_emb": nrm((V, H)),
        "pos_emb": nrm((P, H)),
        "type_emb": nrm((T, H)),
        "emb_ln_g": jnp.ones((H,), jnp.float32),
        "emb_ln_b": jnp.zeros((H,), jnp.float32),
        "layers": [],
        "cls_w1": nrm((H, H)), "cls_b1": jnp.zeros((H,), jnp.float32),
        "cls_w2": nrm((H, 2)), "cls_b2": jnp.zeros((2,), jnp.float32),
    }
    for _ in range(L):
        params["layers"].append({
            "wq": nrm((H, H)), "bq": jnp.zeros((H,), jnp.float32),
            "wk": nrm((H, H)), "bk": jnp.zeros((H,), jnp.float32),
            "wv": nrm((H, H)), "bv": jnp.zeros((H,), jnp.float32),
            "wo": nrm((H, H)), "bo": jnp.zeros((H,), jnp.float32),
            "ln1_g": jnp.ones((H,), jnp.float32), "ln1_b": jnp.zeros((H,), jnp.float32),
            "w1": nrm((H, I)), "b1": jnp.zeros((I,), jnp.float32),
            "w2": nrm((I, H)), "b2": jnp.zeros((H,), jnp.float32),
            "ln2_g": jnp.ones((H,), jnp.float32), "ln2_b": jnp.zeros((H,), jnp.float32),
        })
    return params


def prepare_params(raw, cfg):
    """One-time weight prep: fuse Q/K/V, cast MXU weights to bf16, pad classifier to 128 lanes."""
    H = cfg["hidden"]
    NPAD = 128
    w2p = jnp.zeros((H, NPAD), jnp.float32).at[:, :2].set(raw["cls_w2"])
    b2p = jnp.zeros((NPAD,), jnp.float32).at[:2].set(raw["cls_b2"])
    prep = {
        "word_emb": raw["word_emb"], "pos_emb": raw["pos_emb"], "type_emb": raw["type_emb"],
        "emb_ln_g": raw["emb_ln_g"], "emb_ln_b": raw["emb_ln_b"],
        "cls_w1": raw["cls_w1"].astype(jnp.bfloat16), "cls_b1": raw["cls_b1"],
        "cls_w2p": w2p.astype(jnp.bfloat16), "cls_b2p": b2p,
        "layers": [],
    }
    for lyr in raw["layers"]:
        prep["layers"].append({
            "wqkv": jnp.concatenate([lyr["wq"], lyr["wk"], lyr["wv"]], axis=1).astype(jnp.bfloat16),
            "bqkv": jnp.concatenate([lyr["bq"], lyr["bk"], lyr["bv"]]),
            "wo": lyr["wo"].astype(jnp.bfloat16), "bo": lyr["bo"],
            "ln1_g": lyr["ln1_g"], "ln1_b": lyr["ln1_b"],
            "w1": lyr["w1"].astype(jnp.bfloat16), "b1": lyr["b1"],
            "w2": lyr["w2"].astype(jnp.bfloat16), "b2": lyr["b2"],
            "ln2_g": lyr["ln2_g"], "ln2_b": lyr["ln2_b"],
        })
    return prep


# ------------------------------ model forward ------------------------------- #

def bert_encoder(params, input_ids, attention_mask, segment_ids, cfg):
    B, S = input_ids.shape
    H, nH = cfg["hidden"], cfg["heads"]
    Dh = H // nH
    M = B * S

    # Embeddings (gather is XLA glue), LayerNorm in Pallas.
    x = (params["word_emb"][input_ids]
         + params["pos_emb"][jnp.arange(S)][None, :, :]
         + params["type_emb"][segment_ids]).reshape(M, H)
    x = layernorm(x, params["emb_ln_g"], params["emb_ln_b"])          # f32 residual stream

    # Additive attention mask broadcast per head: (B*nH, 1, S).
    mask_add = (1.0 - attention_mask.astype(jnp.float32)) * (-1e9)
    mask_add = jnp.broadcast_to(mask_add[:, None, None, :], (B, nH, 1, S)).reshape(B * nH, 1, S)

    # TODO(synk): head split/merge still goes through XLA reshape/transpose between kernels;
    # folding it into BlockSpec index_maps would need a Dh-wide last block dim (<128).
    def split_heads(t):
        return t.reshape(B, S, nH, Dh).transpose(0, 2, 1, 3).reshape(B * nH, S, Dh)

    def merge_heads(t):
        return t.reshape(B, nH, S, Dh).transpose(0, 2, 1, 3).reshape(M, H)

    for layer in params["layers"]:
        xb = x.astype(jnp.bfloat16)
        # Fused QKV projection: one (H, 3H) matmul instead of three (H, H) matmuls.
        qkv = matmul_bias_act(xb, layer["wqkv"], layer["bqkv"])        # (M, 3H) bf16
        q, k, v = qkv[:, :H], qkv[:, H:2 * H], qkv[:, 2 * H:]
        ctx = flash_attention(split_heads(q), split_heads(k), split_heads(v), mask_add)
        ctx = merge_heads(ctx)                                         # (M, H) bf16
        # Output projection + residual + LayerNorm fused into one kernel.
        x = matmul_residual_ln(ctx, layer["wo"], layer["bo"], x,
                               layer["ln1_g"], layer["ln1_b"])
        # FFN: gelu matmul, then w2 matmul with residual+LN epilogue.
        inter = matmul_bias_act(x.astype(jnp.bfloat16), layer["w1"], layer["b1"],
                                activation="gelu")                     # (M, I) bf16
        x = matmul_residual_ln(inter, layer["w2"], layer["b2"], x,
                               layer["ln2_g"], layer["ln2_b"])

    return x.reshape(B, S, H)


@functools.partial(jax.jit, static_argnames=("cfg_tuple",))
def _logits_fn(params, input_ids, attention_mask, segment_ids, cfg_tuple):
    cfg = dict(cfg_tuple)
    seq_out = bert_encoder(params, input_ids, attention_mask, segment_ids, cfg)
    pooled = seq_out[:, 0, :]                       # bert_sequence_output[:, 0, :]
    logits_pad = classifier_head(pooled, params["cls_w1"], params["cls_b1"],
                                 params["cls_w2p"], params["cls_b2p"])
    return logits_pad[:, :2]                        # lane-dense kernel output, slice to 2


def retriever_forward(params, input_ids, attention_mask, segment_ids, metadata, cfg):
    """Mirrors RetrieverModel.forward: returns per-example output dicts."""
    logits = _logits_fn(params, input_ids, attention_mask, segment_ids,
                        tuple(sorted(cfg.items())))
    output_dicts = []
    for i in range(len(metadata)):
        output_dicts.append({
            "logits": logits[i],
            "filename_id": metadata[i]["filename_id"],
            "ind": metadata[i]["ind"],
        })
    return output_dicts


# ---------------------------------- main ------------------------------------ #

if __name__ == "__main__":
    # Small BERT-like config (hidden_size drives classifier shapes, as in the module).
    cfg = dict(hidden=32, heads=4, layers=2, intermediate=64,
               vocab=50, max_pos=16, type_vocab=2)

    key = jax.random.PRNGKey(0)
    pkey, k_ids = jax.random.split(key)
    params = prepare_params(init_params(pkey, cfg), cfg)

    B, S = 2, 8
    input_ids = jax.random.randint(k_ids, (B, S), 0, cfg["vocab"], dtype=jnp.int32)
    attention_mask = jnp.ones((B, S), jnp.int32).at[1, 6:].set(0)   # ragged example
    segment_ids = jnp.zeros((B, S), jnp.int32).at[:, 4:].set(1)
    metadata = [{"filename_id": f"doc_{i}", "ind": i} for i in range(B)]

    outs = retriever_forward(params, input_ids, attention_mask, segment_ids, metadata, cfg)
    for d in outs:
        jax.block_until_ready(d["logits"])
        assert d["logits"].shape == (2,)

    # TODO(synk): CrossEntropyLoss / optimizer / lr-scheduler config are training-only
    # and unused in forward; pretrained-checkpoint loading replaced by synthetic params.
    print("KERNEL_OK")
</pallas_src>

<mosaic_0001>
module attributes {stable_mosaic.version = 11 : i64} {
  func.func @_ln_kernel(%arg0: i32, %arg1: memref<16x32xf32, #tpu.memory_space<vmem>>, %arg2: memref<1x32xf32, #tpu.memory_space<vmem>>, %arg3: memref<1x32xf32, #tpu.memory_space<vmem>>, %arg4: memref<16x32xf32, #tpu.memory_space<vmem>>) attributes {dimension_semantics = [#tpu.dimension_semantics<parallel>], iteration_bounds = array<i64: 1>, scalar_prefetch = 0 : i64, scratch_operands = 0 : i64, tpu.core_type = #tpu.core_type<tc>, window_params = [{transform_indices = @transform_0, window_bounds = array<i64: 16, 32>}, {pipeline_mode = #tpu.pipeline_mode<synchronous>, transform_indices = @transform_1, window_bounds = array<i64: 1, 32>}, {pipeline_mode = #tpu.pipeline_mode<synchronous>, transform_indices = @transform_2, window_bounds = array<i64: 1, 32>}, {transform_indices = @transform_3, window_bounds = array<i64: 16, 32>}]} {
    %c0 = arith.constant 0 : index
    %c0_0 = arith.constant 0 : index
    %0 = vector.load %arg1[%c0, %c0_0] : memref<16x32xf32, #tpu.memory_space<vmem>>, vector<16x32xf32>
    %cst = arith.constant dense<0.000000e+00> : vector<16xf32>
    %1 = vector.multi_reduction <add>, %0, %cst [1] : vector<16x32xf32> to vector<16xf32>
    %2 = vector.shape_cast %1 : vector<16xf32> to vector<16x1xf32>
    %cst_1 = arith.constant 3.200000e+01 : f32
    %3 = vector.broadcast %cst_1 : f32 to vector<16x1xf32>
    %4 = arith.divf %2, %3 : vector<16x1xf32>
    %5 = vector.broadcast %4 : vector<16x1xf32> to vector<16x32xf32>
    %6 = arith.subf %0, %5 : vector<16x32xf32>
    %7 = vector.broadcast %4 : vector<16x1xf32> to vector<16x32xf32>
    %8 = arith.subf %0, %7 : vector<16x32xf32>
    %9 = arith.mulf %6, %8 : vector<16x32xf32>
    %cst_2 = arith.constant dense<0.000000e+00> : vector<16xf32>
    %10 = vector.multi_reduction <add>, %9, %cst_2 [1] : vector<16x32xf32> to vector<16xf32>
    %11 = vector.shape_cast %10 : vector<16xf32> to vector<16x1xf32>
    %cst_3 = arith.constant 3.200000e+01 : f32
    %12 = vector.broadcast %cst_3 : f32 to vector<16x1xf32>
    %13 = arith.divf %11, %12 : vector<16x1xf32>
    %14 = vector.broadcast %4 : vector<16x1xf32> to vector<16x32xf32>
    %15 = arith.subf %0, %14 : vector<16x32xf32>
    %cst_4 = arith.constant 9.99999996E-13 : f32
    %16 = vector.broadcast %cst_4 : f32 to vector<16x1xf32>
    %17 = arith.addf %13, %16 : vector<16x1xf32>
    %18 = math.rsqrt %17 : vector<16x1xf32>
    %19 = vector.broadcast %18 : vector<16x1xf32> to vector<16x32xf32>
    %20 = arith.mulf %15, %19 : vector<16x32xf32>
    %c0_5 = arith.constant 0 : index
    %c0_6 = arith.constant 0 : index
    %21 = vector.load %arg2[%c0_5, %c0_6] : memref<1x32xf32, #tpu.memory_space<vmem>>, vector<1x32xf32>
    %22 = vector.broadcast %21 : vector<1x32xf32> to vector<16x32xf32>
    %23 = arith.mulf %20, %22 : vector<16x32xf32>
    %c0_7 = arith.constant 0 : index
    %c0_8 = arith.constant 0 : index
    %24 = vector.load %arg3[%c0_7, %c0_8] : memref<1x32xf32, #tpu.memory_space<vmem>>, vector<1x32xf32>
    %25 = vector.broadcast %24 : vector<1x32xf32> to vector<16x32xf32>
    %26 = arith.addf %23, %25 : vector<16x32xf32>
    %c0_9 = arith.constant 0 : index
    %c0_10 = arith.constant 0 : index
    %27 = vector.load %arg4[%c0_9, %c0_10] : memref<16x32xf32, #tpu.memory_space<vmem>>, vector<16x32xf32>
    tpu.vector_store %arg4[%c0_9, %c0_10], %26 {strides = array<i32>} : memref<16x32xf32, #tpu.memory_space<vmem>>, vector<16x32xf32>,
    return
  }
  func.func @transform_0(%arg0: i32) -> (i32, i32) {
    %c0_i32 = arith.constant 0 : i32
    %c0_i32_0 = arith.constant 0 : i32
    return %arg0, %c0_i32 : i32, i32
  }
  func.func @transform_1(%arg0: i32) -> (i32, i32) {
    %c0_i32 = arith.constant 0 : i32
    %c0_i32_0 = arith.constant 0 : i32
    %c0_i32_1 = arith.constant 0 : i32
    return %c0_i32, %c0_i32_0 : i32, i32
  }
  func.func @transform_2(%arg0: i32) -> (i32, i32) {
    %c0_i32 = arith.constant 0 : i32
    %c0_i32_0 = arith.constant 0 : i32
    %c0_i32_1 = arith.constant 0 : i32
    return %c0_i32, %c0_i32_0 : i32, i32
  }
  func.func @transform_3(%arg0: i32) -> (i32, i32) {
    %c0_i32 = arith.constant 0 : i32
    %c0_i32_0 = arith.constant 0 : i32
    return %arg0, %c0_i32 : i32, i32
  }
}

module attributes {stable_mosaic.version = 11 : i64} {
  func.func @_mm_bias_act_kernel(%arg0: i32, %arg1: i32, %arg2: i32, %arg3: memref<16x32xbf16, #tpu.memory_space<vmem>>, %arg4: memref<32x96xbf16, #tpu.memory_space<vmem>>, %arg5: memref<1x96xf32, #tpu.memory_space<vmem>>, %arg6: memref<16x96xbf16, #tpu.memory_space<vmem>>, %arg7: memref<16x96xf32, #tpu.memory_space<vmem>>) attributes {dimension_semantics = [#tpu.dimension_semantics<parallel>, #tpu.dimension_semantics<parallel>, #tpu.dimension_semantics<arbitrary>], iteration_bounds = array<i64: 1, 1, 1>, scalar_prefetch = 0 : i64, scratch_operands = 1 : i64, tpu.core_type = #tpu.core_type<tc>, window_params = [{transform_indices = @transform_0, window_bounds = array<i64: 16, 32>}, {transform_indices = @transform_1, window_bounds = array<i64: 32, 96>}, {transform_indices = @transform_2, window_bounds = array<i64: 1, 96>}, {transform_indices = @transform_3, window_bounds = array<i64: 16, 96>}]} {
    %c0_i32 = arith.constant 0 : i32
    %0 = arith.cmpi eq, %arg2, %c0_i32 : i32
    %1 = arith.extui %0 : i1 to i32
    %c0_i32_0 = arith.constant 0 : i32
    %2 = arith.cmpi ne, %1, %c0_i32_0 : i32
    scf.if %2 {
      %cst_10 = arith.constant 0.000000e+00 : f32
      %12 = vector.broadcast %cst_10 : f32 to vector<16x96xf32>
      %c0_11 = arith.constant 0 : index
      %c0_12 = arith.constant 0 : index
      %13 = vector.load %arg7[%c0_11, %c0_12] : memref<16x96xf32, #tpu.memory_space<vmem>>, vector<16x96xf32>
      tpu.vector_store %arg7[%c0_11, %c0_12], %12 {strides = array<i32>} : memref<16x96xf32, #tpu.memory_space<vmem>>, vector<16x96xf32>,
    } else {
    }
    %c0 = arith.constant 0 : index
    %c0_1 = arith.constant 0 : index
    %3 = vector.load %arg7[%c0, %c0_1] : memref<16x96xf32, #tpu.memory_space<vmem>>, vector<16x96xf32>
    %c0_2 = arith.constant 0 : index
    %c0_3 = arith.constant 0 : index
    %4 = vector.load %arg3[%c0_2, %c0_3] : memref<16x32xbf16, #tpu.memory_space<vmem>>, vector<16x32xbf16>
    %c0_4 = arith.constant 0 : index
    %c0_5 = arith.constant 0 : index
    %5 = vector.load %arg4[%c0_4, %c0_5] : memref<32x96xbf16, #tpu.memory_space<vmem>>, vector<32x96xbf16>
    %cst = arith.constant dense<0.000000e+00> : vector<16x96xf32>
    %6 = tpu.matmul %4, %5, %cst {dimension_numbers = #tpu.dot_dimension_numbers<[1], [0], [0], [1], [0, 0, 1, 1], [], []>} : vector<16x32xbf16>, vector<32x96xbf16>, vector<16x96xf32> -> vector<16x96xf32>
    %7 = arith.addf %3, %6 : vector<16x96xf32>
    %c0_6 = arith.constant 0 : index
    %c0_7 = arith.constant 0 : index
    %8 = vector.load %arg7[%c0_6, %c0_7] : memref<16x96xf32, #tpu.memory_space<vmem>>, vector<16x96xf32>
    tpu.vector_store %arg7[%c0_6, %c0_7], %7 {strides = array<i32>} : memref<16x96xf32, #tpu.memory_space<vmem>>, vector<16x96xf32>,
    %c0_i32_8 = arith.constant 0 : i32
    %9 = arith.cmpi eq, %arg2, %c0_i32_8 : i32
    %10 = arith.extui %9 : i1 to i32
    %c0_i32_9 = arith.constant 0 : i32
    %11 = arith.cmpi ne, %10, %c0_i32_9 : i32
    scf.if %11 {
      %c0_10 = arith.constant 0 : index
      %c0_11 = arith.constant 0 : index
      %12 = vector.load %arg7[%c0_10, %c0_11] : memref<16x96xf32, #tpu.memory_space<vmem>>, vector<16x96xf32>
      %c0_12 = arith.constant 0 : index
      %c0_13 = arith.constant 0 : index
      %13 = vector.load %arg5[%c0_12, %c0_13] : memref<1x96xf32, #tpu.memory_space<vmem>>, vector<1x96xf32>
      %14 = vector.broadcast %13 : vector<1x96xf32> to vector<16x96xf32>
      %15 = arith.addf %12, %14 : vector<16x96xf32>
      %16 = arith.truncf %15 : vector<16x96xf32> to vector<16x96xbf16>
      %c0_14 = arith.constant 0 : index
      %c0_15 = arith.constant 0 : index
      %17 = vector.load %arg6[%c0_14, %c0_15] : memref<16x96xbf16, #tpu.memory_space<vmem>>, vector<16x96xbf16>
      tpu.vector_store %arg6[%c0_14, %c0_15], %16 {strides = array<i32>} : memref<16x96xbf16, #tpu.memory_space<vmem>>, vector<16x96xbf16>,
    } else {
    }
    return
  }
  func.func @transform_0(%arg0: i32, %arg1: i32, %arg2: i32) -> (i32, i32) {
    %c0_i32 = arith.constant 0 : i32
    return %arg0, %arg2 : i32, i32
  }
  func.func @transform_1(%arg0: i32, %arg1: i32, %arg2: i32) -> (i32, i32) {
    %c0_i32 = arith.constant 0 : i32
    return %arg2, %arg1 : i32, i32
  }
  func.func @transform_2(%arg0: i32, %arg1: i32, %arg2: i32) -> (i32, i32) {
    %c0_i32 = arith.constant 0 : i32
    %c0_i32_0 = arith.constant 0 : i32
    return %c0_i32, %arg1 : i32, i32
  }
  func.func @transform_3(%arg0: i32, %arg1: i32, %arg2: i32) -> (i32, i32) {
    %c0_i32 = arith.constant 0 : i32
    return %arg0, %arg1 : i32, i32
  }
}

module attributes {stable_mosaic.version = 11 : i64} {
  func.func @_flash_kernel(%arg0: i32, %arg1: i32, %arg2: i32, %arg3: memref<8x8x8xbf16, #tpu.memory_space<vmem>>, %arg4: memref<8x8x8xbf16, #tpu.memory_space<vmem>>, %arg5: memref<8x8x8xbf16, #tpu.memory_space<vmem>>, %arg6: memref<8x1x8xf32, #tpu.memory_space<vmem>>, %arg7: memref<8x8x8xbf16, #tpu.memory_space<vmem>>, %arg8: memref<8x8x1xf32, #tpu.memory_space<vmem>>, %arg9: memref<8x8x1xf32, #tpu.memory_space<vmem>>, %arg10: memref<8x8x8xf32, #tpu.memory_space<vmem>>) attributes {dimension_semantics = [#tpu.dimension_semantics<parallel>, #tpu.dimension_semantics<parallel>, #tpu.dimension_semantics<arbitrary>], iteration_bounds = array<i64: 1, 1, 1>, scalar_prefetch = 0 : i64, scratch_operands = 3 : i64, tpu.core_type = #tpu.core_type<tc>, window_params = [{transform_indices = @transform_0, window_bounds = array<i64: 8, 8, 8>}, {transform_indices = @transform_1, window_bounds = array<i64: 8, 8, 8>}, {transform_indices = @transform_2, window_bounds = array<i64: 8, 8, 8>}, {transform_indices = @transform_3, window_bounds = array<i64: 8, 1, 8>}, {transform_indices = @transform_4, window_bounds = array<i64: 8, 8, 8>}]} {
    %c0_i32 = arith.constant 0 : i32
    %0 = arith.cmpi eq, %arg2, %c0_i32 : i32
    %1 = arith.extui %0 : i1 to i32
    %c0_i32_0 = arith.constant 0 : i32
    %2 = arith.cmpi ne, %1, %c0_i32_0 : i32
    scf.if %2 {
      %cst_39 = arith.constant -1.000000e+30 : f32
      %39 = vector.broadcast %cst_39 : f32 to vector<8x8x1xf32>
      %c0_40 = arith.constant 0 : index
      %c0_41 = arith.constant 0 : index
      %c0_42 = arith.constant 0 : index
      %40 = vector.load %arg8[%c0_40, %c0_41, %c0_42] : memref<8x8x1xf32, #tpu.memory_space<vmem>>, vector<8x8x1xf32>
      tpu.vector_store %arg8[%c0_40, %c0_41, %c0_42], %39 {strides = array<i32>} : memref<8x8x1xf32, #tpu.memory_space<vmem>>, vector<8x8x1xf32>,
      %cst_43 = arith.constant 0.000000e+00 : f32
      %41 = vector.broadcast %cst_43 : f32 to vector<8x8x1xf32>
      %c0_44 = arith.constant 0 : index
      %c0_45 = arith.constant 0 : index
      %c0_46 = arith.constant 0 : index
      %42 = vector.load %arg9[%c0_44, %c0_45, %c0_46] : memref<8x8x1xf32, #tpu.memory_space<vmem>>, vector<8x8x1xf32>
      tpu.vector_store %arg9[%c0_44, %c0_45, %c0_46], %41 {strides = array<i32>} : memref<8x8x1xf32, #tpu.memory_space<vmem>>, vector<8x8x1xf32>,
      %cst_47 = arith.constant 0.000000e+00 : f32
      %43 = vector.broadcast %cst_47 : f32 to vector<8x8x8xf32>
      %c0_48 = arith.constant 0 : index
      %c0_49 = arith.constant 0 : index
      %c0_50 = arith.constant 0 : index
      %44 = vector.load %arg10[%c0_48, %c0_49, %c0_50] : memref<8x8x8xf32, #tpu.memory_space<vmem>>, vector<8x8x8xf32>
      tpu.vector_store %arg10[%c0_48, %c0_49, %c0_50], %43 {strides = array<i32>} : memref<8x8x8xf32, #tpu.memory_space<vmem>>, vector<8x8x8xf32>,
    } else {
    }
    %c0 = arith.constant 0 : index
    %c0_1 = arith.constant 0 : index
    %c0_2 = arith.constant 0 : index
    %3 = vector.load %arg3[%c0, %c0_1, %c0_2] : memref<8x8x8xbf16, #tpu.memory_space<vmem>>, vector<8x8x8xbf16>
    %c0_3 = arith.constant 0 : index
    %c0_4 = arith.constant 0 : index
    %c0_5 = arith.constant 0 : index
    %4 = vector.load %arg4[%c0_3, %c0_4, %c0_5] : memref<8x8x8xbf16, #tpu.memory_space<vmem>>, vector<8x8x8xbf16>
    "tpu.trace_start"() <{level = 10 : i32, message = "bqd,bkd->bqk"}> : () -> ()
    %cst = arith.constant dense<0.000000e+00> : vector<8x8x8xf32>
    %5 = tpu.matmul %3, %4, %cst {dimension_numbers = #tpu.dot_dimension_numbers<[2], [2], [1], [1], [0, 0, 0, 1, 1, 1], [0], [0]>} : vector<8x8x8xbf16>, vector<8x8x8xbf16>, vector<8x8x8xf32> -> vector<8x8x8xf32>
    "tpu.trace_stop"() : () -> ()
    %cst_6 = arith.constant 0.353553385 : f32
    %6 = vector.broadcast %cst_6 : f32 to vector<8x8x8xf32>
    %7 = arith.mulf %5, %6 : vector<8x8x8xf32>
    %c0_7 = arith.constant 0 : index
    %c0_8 = arith.constant 0 : index
    %c0_9 = arith.constant 0 : index
    %8 = vector.load %arg6[%c0_7, %c0_8, %c0_9] : memref<8x1x8xf32, #tpu.memory_space<vmem>>, vector<8x1x8xf32>
    %9 = vector.broadcast %8 : vector<8x1x8xf32> to vector<8x8x8xf32>
    %10 = arith.addf %7, %9 : vector<8x8x8xf32>
    %c0_10 = arith.constant 0 : index
    %c0_11 = arith.constant 0 : index
    %c0_12 = arith.constant 0 : index
    %11 = vector.load %arg8[%c0_10, %c0_11, %c0_12] : memref<8x8x1xf32, #tpu.memory_space<vmem>>, vector<8x8x1xf32>
    %cst_13 = arith.constant dense<0xFF800000> : vector<8x8xf32>
    %12 = vector.multi_reduction <maximumf>, %10, %cst_13 [2] : vector<8x8x8xf32> to vector<8x8xf32>
    %13 = vector.shape_cast %12 : vector<8x8xf32> to vector<8x8x1xf32>
    %14 = arith.maximumf %11, %13 : vector<8x8x1xf32>
    %c0_14 = arith.constant 0 : index
    %c0_15 = arith.constant 0 : index
    %c0_16 = arith.constant 0 : index
    %15 = vector.load %arg8[%c0_14, %c0_15, %c0_16] : memref<8x8x1xf32, #tpu.memory_space<vmem>>, vector<8x8x1xf32>
    %16 = arith.subf %15, %14 : vector<8x8x1xf32>
    %17 = math.exp %16 : vector<8x8x1xf32>
    %18 = vector.broadcast %14 : vector<8x8x1xf32> to vector<8x8x8xf32>
    %19 = arith.subf %10, %18 : vector<8x8x8xf32>
    %20 = math.exp %19 : vector<8x8x8xf32>
    %c0_17 = arith.constant 0 : index
    %c0_18 = arith.constant 0 : index
    %c0_19 = arith.constant 0 : index
    %21 = vector.load %arg9[%c0_17, %c0_18, %c0_19] : memref<8x8x1xf32, #tpu.memory_space<vmem>>, vector<8x8x1xf32>
    %22 = arith.mulf %17, %21 : vector<8x8x1xf32>
    %cst_20 = arith.constant dense<0.000000e+00> : vector<8x8xf32>
    %23 = vector.multi_reduction <add>, %20, %cst_20 [2] : vector<8x8x8xf32> to vector<8x8xf32>
    %24 = vector.shape_cast %23 : vector<8x8xf32> to vector<8x8x1xf32>
    %25 = arith.addf %22, %24 : vector<8x8x1xf32>
    %c0_21 = arith.constant 0 : index
    %c0_22 = arith.constant 0 : index
    %c0_23 = arith.constant 0 : index
    %26 = vector.load %arg9[%c0_21, %c0_22, %c0_23] : memref<8x8x1xf32, #tpu.memory_space<vmem>>, vector<8x8x1xf32>
    tpu.vector_store %arg9[%c0_21, %c0_22, %c0_23], %25 {strides = array<i32>} : memref<8x8x1xf32, #tpu.memory_space<vmem>>, vector<8x8x1xf32>,
    %c0_24 = arith.constant 0 : index
    %c0_25 = arith.constant 0 : index
    %c0_26 = arith.constant 0 : index
    %27 = vector.load %arg10[%c0_24, %c0_25, %c0_26] : memref<8x8x8xf32, #tpu.memory_space<vmem>>, vector<8x8x8xf32>
    %28 = vector.broadcast %17 : vector<8x8x1xf32> to vector<8x8x8xf32>
    %29 = arith.mulf %28, %27 : vector<8x8x8xf32>
    %30 = arith.truncf %20 : vector<8x8x8xf32> to vector<8x8x8xbf16>
    %c0_27 = arith.constant 0 : index
    %c0_28 = arith.constant 0 : index
    %c0_29 = arith.constant 0 : index
    %31 = vector.load %arg5[%c0_27, %c0_28, %c0_29] : memref<8x8x8xbf16, #tpu.memory_space<vmem>>, vector<8x8x8xbf16>
    "tpu.trace_start"() <{level = 10 : i32, message = "bqk,bkd->bqd"}> : () -> ()
    %cst_30 = arith.constant dense<0.000000e+00> : vector<8x8x8xf32>
    %32 = tpu.matmul %30, %31, %cst_30 {dimension_numbers = #tpu.dot_dimension_numbers<[2], [1], [1], [2], [0, 0, 0, 1, 1, 2], [0], [0]>} : vector<8x8x8xbf16>, vector<8x8x8xbf16>, vector<8x8x8xf32> -> vector<8x8x8xf32>
    "tpu.trace_stop"() : () -> ()
    %33 = arith.addf %29, %32 : vector<8x8x8xf32>
    %c0_31 = arith.constant 0 : index
    %c0_32 = arith.constant 0 : index
    %c0_33 = arith.constant 0 : index
    %34 = vector.load %arg10[%c0_31, %c0_32, %c0_33] : memref<8x8x8xf32, #tpu.memory_space<vmem>>, vector<8x8x8xf32>
    tpu.vector_store %arg10[%c0_31, %c0_32, %c0_33], %33 {strides = array<i32>} : memref<8x8x8xf32, #tpu.memory_space<vmem>>, vector<8x8x8xf32>,
    %c0_34 = arith.constant 0 : index
    %c0_35 = arith.constant 0 : index
    %c0_36 = arith.constant 0 : index
    %35 = vector.load %arg8[%c0_34, %c0_35, %c0_36] : memref<8x8x1xf32, #tpu.memory_space<vmem>>, vector<8x8x1xf32>
    tpu.vector_store %arg8[%c0_34, %c0_35, %c0_36], %14 {strides = array<i32>} : memref<8x8x1xf32, #tpu.memory_space<vmem>>, vector<8x8x1xf32>,
    %c0_i32_37 = arith.constant 0 : i32
    %36 = arith.cmpi eq, %arg2, %c0_i32_37 : i32
    %37 = arith.extui %36 : i1 to i32
    %c0_i32_38 = arith.constant 0 : i32
    %38 = arith.cmpi ne, %37, %c0_i32_38 : i32
    scf.if %38 {
      %c0_39 = arith.constant 0 : index
      %c0_40 = arith.constant 0 : index
      %c0_41 = arith.constant 0 : index
      %39 = vector.load %arg10[%c0_39, %c0_40, %c0_41] : memref<8x8x8xf32, #tpu.memory_space<vmem>>, vector<8x8x8xf32>
      %c0_42 = arith.constant 0 : index
      %c0_43 = arith.constant 0 : index
      %c0_44 = arith.constant 0 : index
      %40 = vector.load %arg9[%c0_42, %c0_43, %c0_44] : memref<8x8x1xf32, #tpu.memory_space<vmem>>, vector<8x8x1xf32>
      %41 = tpu.reciprocal %40 {approx = true} : vector<8x8x1xf32> -> vector<8x8x1xf32>
      %42 = vector.broadcast %41 : vector<8x8x1xf32> to vector<8x8x8xf32>
      %43 = arith.mulf %39, %42 : vector<8x8x8xf32>
      %44 = arith.truncf %43 : vector<8x8x8xf32> to vector<8x8x8xbf16>
      %c0_45 = arith.constant 0 : index
      %c0_46 = arith.constant 0 : index
      %c0_47 = arith.constant 0 : index
      %45 = vector.load %arg7[%c0_45, %c0_46, %c0_47] : memref<8x8x8xbf16, #tpu.memory_space<vmem>>, vector<8x8x8xbf16>
      tpu.vector_store %arg7[%c0_45, %c0_46, %c0_47], %44 {strides = array<i32>} : memref<8x8x8xbf16, #tpu.memory_space<vmem>>, vector<8x8x8xbf16>,
    } else {
    }
    return
  }
  func.func @transform_0(%arg0: i32, %arg1: i32, %arg2: i32) -> (i32, i32, i32) {
    %c0_i32 = arith.constant 0 : i32
    %c0_i32_0 = arith.constant 0 : i32
    return %arg0, %arg1, %c0_i32 : i32, i32, i32
  }
  func.func @transform_1(%arg0: i32, %arg1: i32, %arg2: i32) -> (i32, i32, i32) {
    %c0_i32 = arith.constant 0 : i32
    %c0_i32_0 = arith.constant 0 : i32
    return %arg0, %arg2, %c0_i32 : i32, i32, i32
  }
  func.func @transform_2(%arg0: i32, %arg1: i32, %arg2: i32) -> (i32, i32, i32) {
    %c0_i32 = arith.constant 0 : i32
    %c0_i32_0 = arith.constant 0 : i32
    return %arg0, %arg2, %c0_i32 : i32, i32, i32
  }
  func.func @transform_3(%arg0: i32, %arg1: i32, %arg2: i32) -> (i32, i32, i32) {
    %c0_i32 = arith.constant 0 : i32
    %c0_i32_0 = arith.constant 0 : i32
    return %arg0, %c0_i32, %arg2 : i32, i32, i32
  }
  func.func @transform_4(%arg0: i32, %arg1: i32, %arg2: i32) -> (i32, i32, i32) {
    %c0_i32 = arith.constant 0 : i32
    %c0_i32_0 = arith.constant 0 : i32
    return %arg0, %arg1, %c0_i32 : i32, i32, i32
  }
}

module attributes {stable_mosaic.version = 11 : i64} {
  func.func @_mm_res_ln_kernel(%arg0: i32, %arg1: i32, %arg2: memref<16x32xbf16, #tpu.memory_space<vmem>>, %arg3: memref<32x32xbf16, #tpu.memory_space<vmem>>, %arg4: memref<1x32xf32, #tpu.memory_space<vmem>>, %arg5: memref<16x32xf32, #tpu.memory_space<vmem>>, %arg6: memref<1x32xf32, #tpu.memory_space<vmem>>, %arg7: memref<1x32xf32, #tpu.memory_space<vmem>>, %arg8: memref<16x32xf32, #tpu.memory_space<vmem>>, %arg9: memref<16x32xf32, #tpu.memory_space<vmem>>) attributes {dimension_semantics = [#tpu.dimension_semantics<parallel>, #tpu.dimension_semantics<arbitrary>], iteration_bounds = array<i64: 1, 1>, scalar_prefetch = 0 : i64, scratch_operands = 1 : i64, tpu.core_type = #tpu.core_type<tc>, window_params = [{transform_indices = @transform_0, window_bounds = array<i64: 16, 32>}, {transform_indices = @transform_1, window_bounds = array<i64: 32, 32>}, {pipeline_mode = #tpu.pipeline_mode<synchronous>, transform_indices = @transform_2, window_bounds = array<i64: 1, 32>}, {transform_indices = @transform_3, window_bounds = array<i64: 16, 32>}, {pipeline_mode = #tpu.pipeline_mode<synchronous>, transform_indices = @transform_4, window_bounds = array<i64: 1, 32>}, {pipeline_mode = #tpu.pipeline_mode<synchronous>, transform_indices = @transform_5, window_bounds = array<i64: 1, 32>}, {transform_indices = @transform_6, window_bounds = array<i64: 16, 32>}]} {
    %c0_i32 = arith.constant 0 : i32
    %0 = arith.cmpi eq, %arg1, %c0_i32 : i32
    %1 = arith.extui %0 : i1 to i32
    %c0_i32_0 = arith.constant 0 : i32
    %2 = arith.cmpi ne, %1, %c0_i32_0 : i32
    scf.if %2 {
      %cst_10 = arith.constant 0.000000e+00 : f32
      %12 = vector.broadcast %cst_10 : f32 to vector<16x32xf32>
      %c0_11 = arith.constant 0 : index
      %c0_12 = arith.constant 0 : index
      %13 = vector.load %arg9[%c0_11, %c0_12] : memref<16x32xf32, #tpu.memory_space<vmem>>, vector<16x32xf32>
      tpu.vector_store %arg9[%c0_11, %c0_12], %12 {strides = array<i32>} : memref<16x32xf32, #tpu.memory_space<vmem>>, vector<16x32xf32>,
    } else {
    }
    %c0 = arith.constant 0 : index
    %c0_1 = arith.constant 0 : index
    %3 = vector.load %arg9[%c0, %c0_1] : memref<16x32xf32, #tpu.memory_space<vmem>>, vector<16x32xf32>
    %c0_2 = arith.constant 0 : index
    %c0_3 = arith.constant 0 : index
    %4 = vector.load %arg2[%c0_2, %c0_3] : memref<16x32xbf16, #tpu.memory_space<vmem>>, vector<16x32xbf16>
    %c0_4 = arith.constant 0 : index
    %c0_5 = arith.constant 0 : index
    %5 = vector.load %arg3[%c0_4, %c0_5] : memref<32x32xbf16, #tpu.memory_space<vmem>>, vector<32x32xbf16>
    %cst = arith.constant dense<0.000000e+00> : vector<16x32xf32>
    %6 = tpu.matmul %4, %5, %cst {dimension_numbers = #tpu.dot_dimension_numbers<[1], [0], [0], [1], [0, 0, 1, 1], [], []>} : vector<16x32xbf16>, vector<32x32xbf16>, vector<16x32xf32> -> vector<16x32xf32>
    %7 = arith.addf %3, %6 : vector<16x32xf32>
    %c0_6 = arith.constant 0 : index
    %c0_7 = arith.constant 0 : index
    %8 = vector.load %arg9[%c0_6, %c0_7] : memref<16x32xf32, #tpu.memory_space<vmem>>, vector<16x32xf32>
    tpu.vector_store %arg9[%c0_6, %c0_7], %7 {strides = array<i32>} : memref<16x32xf32, #tpu.memory_space<vmem>>, vector<16x32xf32>,
    %c0_i32_8 = arith.constant 0 : i32
    %9 = arith.cmpi eq, %arg1, %c0_i32_8 : i32
    %10 = arith.extui %9 : i1 to i32
    %c0_i32_9 = arith.constant 0 : i32
    %11 = arith.cmpi ne, %10, %c0_i32_9 : i32
    scf.if %11 {
      %c0_10 = arith.constant 0 : index
      %c0_11 = arith.constant 0 : index
      %12 = vector.load %arg9[%c0_10, %c0_11] : memref<16x32xf32, #tpu.memory_space<vmem>>, vector<16x32xf32>
      %c0_12 = arith.constant 0 : index
      %c0_13 = arith.constant 0 : index
      %13 = vector.load %arg4[%c0_12, %c0_13] : memref<1x32xf32, #tpu.memory_space<vmem>>, vector<1x32xf32>
      %14 = vector.broadcast %13 : vector<1x32xf32> to vector<16x32xf32>
      %15 = arith.addf %12, %14 : vector<16x32xf32>
      %c0_14 = arith.constant 0 : index
      %c0_15 = arith.constant 0 : index
      %16 = vector.load %arg5[%c0_14, %c0_15] : memref<16x32xf32, #tpu.memory_space<vmem>>, vector<16x32xf32>
      %17 = arith.addf %15, %16 : vector<16x32xf32>
      %cst_16 = arith.constant dense<0.000000e+00> : vector<16xf32>
      %18 = vector.multi_reduction <add>, %17, %cst_16 [1] : vector<16x32xf32> to vector<16xf32>
      %19 = vector.shape_cast %18 : vector<16xf32> to vector<16x1xf32>
      %cst_17 = arith.constant 3.200000e+01 : f32
      %20 = vector.broadcast %cst_17 : f32 to vector<16x1xf32>
      %21 = arith.divf %19, %20 : vector<16x1xf32>
      %22 = vector.broadcast %21 : vector<16x1xf32> to vector<16x32xf32>
      %23 = arith.subf %17, %22 : vector<16x32xf32>
      %24 = vector.broadcast %21 : vector<16x1xf32> to vector<16x32xf32>
      %25 = arith.subf %17, %24 : vector<16x32xf32>
      %26 = arith.mulf %23, %25 : vector<16x32xf32>
      %cst_18 = arith.constant dense<0.000000e+00> : vector<16xf32>
      %27 = vector.multi_reduction <add>, %26, %cst_18 [1] : vector<16x32xf32> to vector<16xf32>
      %28 = vector.shape_cast %27 : vector<16xf32> to vector<16x1xf32>
      %cst_19 = arith.constant 3.200000e+01 : f32
      %29 = vector.broadcast %cst_19 : f32 to vector<16x1xf32>
      %30 = arith.divf %28, %29 : vector<16x1xf32>
      %31 = vector.broadcast %21 : vector<16x1xf32> to vector<16x32xf32>
      %32 = arith.subf %17, %31 : vector<16x32xf32>
      %cst_20 = arith.constant 9.99999996E-13 : f32
      %33 = vector.broadcast %cst_20 : f32 to vector<16x1xf32>
      %34 = arith.addf %30, %33 : vector<16x1xf32>
      %35 = math.rsqrt %34 : vector<16x1xf32>
      %36 = vector.broadcast %35 : vector<16x1xf32> to vector<16x32xf32>
      %37 = arith.mulf %32, %36 : vector<16x32xf32>
      %c0_21 = arith.constant 0 : index
      %c0_22 = arith.constant 0 : index
      %38 = vector.load %arg6[%c0_21, %c0_22] : memref<1x32xf32, #tpu.memory_space<vmem>>, vector<1x32xf32>
      %39 = vector.broadcast %38 : vector<1x32xf32> to vector<16x32xf32>
      %40 = arith.mulf %37, %39 : vector<16x32xf32>
      %c0_23 = arith.constant 0 : index
      %c0_24 = arith.constant 0 : index
      %41 = vector.load %arg7[%c0_23, %c0_24] : memref<1x32xf32, #tpu.memory_space<vmem>>, vector<1x32xf32>
      %42 = vector.broadcast %41 : vector<1x32xf32> to vector<16x32xf32>
      %43 = arith.addf %40, %42 : vector<16x32xf32>
      %c0_25 = arith.constant 0 : index
      %c0_26 = arith.constant 0 : index
      %44 = vector.load %arg8[%c0_25, %c0_26] : memref<16x32xf32, #tpu.memory_space<vmem>>, vector<16x32xf32>
      tpu.vector_store %arg8[%c0_25, %c0_26], %43 {strides = array<i32>} : memref<16x32xf32, #tpu.memory_space<vmem>>, vector<16x32xf32>,
    } else {
    }
    return
  }
  func.func @transform_0(%arg0: i32, %arg1: i32) -> (i32, i32) {
    %c0_i32 = arith.constant 0 : i32
    return %arg0, %arg1 : i32, i32
  }
  func.func @transform_1(%arg0: i32, %arg1: i32) -> (i32, i32) {
    %c0_i32 = arith.constant 0 : i32
    %c0_i32_0 = arith.constant 0 : i32
    return %arg1, %c0_i32 : i32, i32
  }
  func.func @transform_2(%arg0: i32, %arg1: i32) -> (i32, i32) {
    %c0_i32 = arith.constant 0 : i32
    %c0_i32_0 = arith.constant 0 : i32
    %c0_i32_1 = arith.constant 0 : i32
    return %c0_i32, %c0_i32_0 : i32, i32
  }
  func.func @transform_3(%arg0: i32, %arg1: i32) -> (i32, i32) {
    %c0_i32 = arith.constant 0 : i32
    %c0_i32_0 = arith.constant 0 : i32
    return %arg0, %c0_i32 : i32, i32
  }
  func.func @transform_4(%arg0: i32, %arg1: i32) -> (i32, i32) {
    %c0_i32 = arith.constant 0 : i32
    %c0_i32_0 = arith.constant 0 : i32
    %c0_i32_1 = arith.constant 0 : i32
    return %c0_i32, %c0_i32_0 : i32, i32
  }
  func.func @transform_5(%arg0: i32, %arg1: i32) -> (i32, i32) {
    %c0_i32 = arith.constant 0 : i32
    %c0_i32_0 = arith.constant 0 : i32
    %c0_i32_1 = arith.constant 0 : i32
    return %c0_i32, %c0_i32_0 : i32, i32
  }
  func.func @transform_6(%arg0: i32, %arg1: i32) -> (i32, i32) {
    %c0_i32 = arith.constant 0 : i32
    %c0_i32_0 = arith.constant 0 : i32
    return %arg0, %c0_i32 : i32, i32
  }
}

module attributes {stable_mosaic.version = 11 : i64} {
  func.func @_mm_bias_act_kernel(%arg0: i32, %arg1: i32, %arg2: i32, %arg3: memref<16x32xbf16, #tpu.memory_space<vmem>>, %arg4: memref<32x64xbf16, #tpu.memory_space<vmem>>, %arg5: memref<1x64xf32, #tpu.memory_space<vmem>>, %arg6: memref<16x64xbf16, #tpu.memory_space<vmem>>, %arg7: memref<16x64xf32, #tpu.memory_space<vmem>>) attributes {dimension_semantics = [#tpu.dimension_semantics<parallel>, #tpu.dimension_semantics<parallel>, #tpu.dimension_semantics<arbitrary>], iteration_bounds = array<i64: 1, 1, 1>, scalar_prefetch = 0 : i64, scratch_operands = 1 : i64, tpu.core_type = #tpu.core_type<tc>, window_params = [{transform_indices = @transform_0, window_bounds = array<i64: 16, 32>}, {transform_indices = @transform_1, window_bounds = array<i64: 32, 64>}, {transform_indices = @transform_2, window_bounds = array<i64: 1, 64>}, {transform_indices = @transform_3, window_bounds = array<i64: 16, 64>}]} {
    %c0_i32 = arith.constant 0 : i32
    %0 = arith.cmpi eq, %arg2, %c0_i32 : i32
    %1 = arith.extui %0 : i1 to i32
    %c0_i32_0 = arith.constant 0 : i32
    %2 = arith.cmpi ne, %1, %c0_i32_0 : i32
    scf.if %2 {
      %cst_10 = arith.constant 0.000000e+00 : f32
      %12 = vector.broadcast %cst_10 : f32 to vector<16x64xf32>
      %c0_11 = arith.constant 0 : index
      %c0_12 = arith.constant 0 : index
      %13 = vector.load %arg7[%c0_11, %c0_12] : memref<16x64xf32, #tpu.memory_space<vmem>>, vector<16x64xf32>
      tpu.vector_store %arg7[%c0_11, %c0_12], %12 {strides = array<i32>} : memref<16x64xf32, #tpu.memory_space<vmem>>, vector<16x64xf32>,
    } else {
    }
    %c0 = arith.constant 0 : index
    %c0_1 = arith.constant 0 : index
    %3 = vector.load %arg7[%c0, %c0_1] : memref<16x64xf32, #tpu.memory_space<vmem>>, vector<16x64xf32>
    %c0_2 = arith.constant 0 : index
    %c0_3 = arith.constant 0 : index
    %4 = vector.load %arg3[%c0_2, %c0_3] : memref<16x32xbf16, #tpu.memory_space<vmem>>, vector<16x32xbf16>
    %c0_4 = arith.constant 0 : index
    %c0_5 = arith.constant 0 : index
    %5 = vector.load %arg4[%c0_4, %c0_5] : memref<32x64xbf16, #tpu.memory_space<vmem>>, vector<32x64xbf16>
    %cst = arith.constant dense<0.000000e+00> : vector<16x64xf32>
    %6 = tpu.matmul %4, %5, %cst {dimension_numbers = #tpu.dot_dimension_numbers<[1], [0], [0], [1], [0, 0, 1, 1], [], []>} : vector<16x32xbf16>, vector<32x64xbf16>, vector<16x64xf32> -> vector<16x64xf32>
    %7 = arith.addf %3, %6 : vector<16x64xf32>
    %c0_6 = arith.constant 0 : index
    %c0_7 = arith.constant 0 : index
    %8 = vector.load %arg7[%c0_6, %c0_7] : memref<16x64xf32, #tpu.memory_space<vmem>>, vector<16x64xf32>
    tpu.vector_store %arg7[%c0_6, %c0_7], %7 {strides = array<i32>} : memref<16x64xf32, #tpu.memory_space<vmem>>, vector<16x64xf32>,
    %c0_i32_8 = arith.constant 0 : i32
    %9 = arith.cmpi eq, %arg2, %c0_i32_8 : i32
    %10 = arith.extui %9 : i1 to i32
    %c0_i32_9 = arith.constant 0 : i32
    %11 = arith.cmpi ne, %10, %c0_i32_9 : i32
    scf.if %11 {
      %c0_10 = arith.constant 0 : index
      %c0_11 = arith.constant 0 : index
      %12 = vector.load %arg7[%c0_10, %c0_11] : memref<16x64xf32, #tpu.memory_space<vmem>>, vector<16x64xf32>
      %c0_12 = arith.constant 0 : index
      %c0_13 = arith.constant 0 : index
      %13 = vector.load %arg5[%c0_12, %c0_13] : memref<1x64xf32, #tpu.memory_space<vmem>>, vector<1x64xf32>
      %14 = vector.broadcast %13 : vector<1x64xf32> to vector<16x64xf32>
      %15 = arith.addf %12, %14 : vector<16x64xf32>
      %cst_14 = arith.constant 5.000000e-01 : f32
      %16 = vector.broadcast %cst_14 : f32 to vector<16x64xf32>
      %17 = arith.mulf %16, %15 : vector<16x64xf32>
      %cst_15 = arith.constant 4.471500e-02 : f32
      %18 = vector.broadcast %cst_15 : f32 to vector<16x64xf32>
      %19 = arith.mulf %18, %15 : vector<16x64xf32>
      %20 = arith.mulf %19, %15 : vector<16x64xf32>
      %21 = arith.mulf %20, %15 : vector<16x64xf32>
      %22 = arith.addf %15, %21 : vector<16x64xf32>
      %cst_16 = arith.constant 0.797884583 : f32
      %23 = vector.broadcast %cst_16 : f32 to vector<16x64xf32>
      %24 = arith.mulf %23, %22 : vector<16x64xf32>
      %25 = math.tanh %24 : vector<16x64xf32>
      %cst_17 = arith.constant 1.000000e+00 : f32
      %26 = vector.broadcast %cst_17 : f32 to vector<16x64xf32>
      %27 = arith.addf %26, %25 : vector<16x64xf32>
      %28 = arith.mulf %17, %27 : vector<16x64xf32>
      %29 = arith.truncf %28 : vector<16x64xf32> to vector<16x64xbf16>
      %c0_18 = arith.constant 0 : index
      %c0_19 = arith.constant 0 : index
      %30 = vector.load %arg6[%c0_18, %c0_19] : memref<16x64xbf16, #tpu.memory_space<vmem>>, vector<16x64xbf16>
      tpu.vector_store %arg6[%c0_18, %c0_19], %29 {strides = array<i32>} : memref<16x64xbf16, #tpu.memory_space<vmem>>, vector<16x64xbf16>,
    } else {
    }
    return
  }
  func.func @transform_0(%arg0: i32, %arg1: i32, %arg2: i32) -> (i32, i32) {
    %c0_i32 = arith.constant 0 : i32
    return %arg0, %arg2 : i32, i32
  }
  func.func @transform_1(%arg0: i32, %arg1: i32, %arg2: i32) -> (i32, i32) {
    %c0_i32 = arith.constant 0 : i32
    return %arg2, %arg1 : i32, i32
  }
  func.func @transform_2(%arg0: i32, %arg1: i32, %arg2: i32) -> (i32, i32) {
    %c0_i32 = arith.constant 0 : i32
    %c0_i32_0 = arith.constant 0 : i32
    return %c0_i32, %arg1 : i32, i32
  }
  func.func @transform_3(%arg0: i32, %arg1: i32, %arg2: i32) -> (i32, i32) {
    %c0_i32 = arith.constant 0 : i32
    return %arg0, %arg1 : i32, i32
  }
}

module attributes {stable_mosaic.version = 11 : i64} {
  func.func @_mm_res_ln_kernel(%arg0: i32, %arg1: i32, %arg2: memref<16x64xbf16, #tpu.memory_space<vmem>>, %arg3: memref<64x32xbf16, #tpu.memory_space<vmem>>, %arg4: memref<1x32xf32, #tpu.memory_space<vmem>>, %arg5: memref<16x32xf32, #tpu.memory_space<vmem>>, %arg6: memref<1x32xf32, #tpu.memory_space<vmem>>, %arg7: memref<1x32xf32, #tpu.memory_space<vmem>>, %arg8: memref<16x32xf32, #tpu.memory_space<vmem>>, %arg9: memref<16x32xf32, #tpu.memory_space<vmem>>) attributes {dimension_semantics = [#tpu.dimension_semantics<parallel>, #tpu.dimension_semantics<arbitrary>], iteration_bounds = array<i64: 1, 1>, scalar_prefetch = 0 : i64, scratch_operands = 1 : i64, tpu.core_type = #tpu.core_type<tc>, window_params = [{transform_indices = @transform_0, window_bounds = array<i64: 16, 64>}, {transform_indices = @transform_1, window_bounds = array<i64: 64, 32>}, {pipeline_mode = #tpu.pipeline_mode<synchronous>, transform_indices = @transform_2, window_bounds = array<i64: 1, 32>}, {transform_indices = @transform_3, window_bounds = array<i64: 16, 32>}, {pipeline_mode = #tpu.pipeline_mode<synchronous>, transform_indices = @transform_4, window_bounds = array<i64: 1, 32>}, {pipeline_mode = #tpu.pipeline_mode<synchronous>, transform_indices = @transform_5, window_bounds = array<i64: 1, 32>}, {transform_indices = @transform_6, window_bounds = array<i64: 16, 32>}]} {
    %c0_i32 = arith.constant 0 : i32
    %0 = arith.cmpi eq, %arg1, %c0_i32 : i32
    %1 = arith.extui %0 : i1 to i32
    %c0_i32_0 = arith.constant 0 : i32
    %2 = arith.cmpi ne, %1, %c0_i32_0 : i32
    scf.if %2 {
      %cst_10 = arith.constant 0.000000e+00 : f32
      %12 = vector.broadcast %cst_10 : f32 to vector<16x32xf32>
      %c0_11 = arith.constant 0 : index
      %c0_12 = arith.constant 0 : index
      %13 = vector.load %arg9[%c0_11, %c0_12] : memref<16x32xf32, #tpu.memory_space<vmem>>, vector<16x32xf32>
      tpu.vector_store %arg9[%c0_11, %c0_12], %12 {strides = array<i32>} : memref<16x32xf32, #tpu.memory_space<vmem>>, vector<16x32xf32>,
    } else {
    }
    %c0 = arith.constant 0 : index
    %c0_1 = arith.constant 0 : index
    %3 = vector.load %arg9[%c0, %c0_1] : memref<16x32xf32, #tpu.memory_space<vmem>>, vector<16x32xf32>
    %c0_2 = arith.constant 0 : index
    %c0_3 = arith.constant 0 : index
    %4 = vector.load %arg2[%c0_2, %c0_3] : memref<16x64xbf16, #tpu.memory_space<vmem>>, vector<16x64xbf16>
    %c0_4 = arith.constant 0 : index
    %c0_5 = arith.constant 0 : index
    %5 = vector.load %arg3[%c0_4, %c0_5] : memref<64x32xbf16, #tpu.memory_space<vmem>>, vector<64x32xbf16>
    %cst = arith.constant dense<0.000000e+00> : vector<16x32xf32>
    %6 = tpu.matmul %4, %5, %cst {dimension_numbers = #tpu.dot_dimension_numbers<[1], [0], [0], [1], [0, 0, 1, 1], [], []>} : vector<16x64xbf16>, vector<64x32xbf16>, vector<16x32xf32> -> vector<16x32xf32>
    %7 = arith.addf %3, %6 : vector<16x32xf32>
    %c0_6 = arith.constant 0 : index
    %c0_7 = arith.constant 0 : index
    %8 = vector.load %arg9[%c0_6, %c0_7] : memref<16x32xf32, #tpu.memory_space<vmem>>, vector<16x32xf32>
    tpu.vector_store %arg9[%c0_6, %c0_7], %7 {strides = array<i32>} : memref<16x32xf32, #tpu.memory_space<vmem>>, vector<16x32xf32>,
    %c0_i32_8 = arith.constant 0 : i32
    %9 = arith.cmpi eq, %arg1, %c0_i32_8 : i32
    %10 = arith.extui %9 : i1 to i32
    %c0_i32_9 = arith.constant 0 : i32
    %11 = arith.cmpi ne, %10, %c0_i32_9 : i32
    scf.if %11 {
      %c0_10 = arith.constant 0 : index
      %c0_11 = arith.constant 0 : index
      %12 = vector.load %arg9[%c0_10, %c0_11] : memref<16x32xf32, #tpu.memory_space<vmem>>, vector<16x32xf32>
      %c0_12 = arith.constant 0 : index
      %c0_13 = arith.constant 0 : index
      %13 = vector.load %arg4[%c0_12, %c0_13] : memref<1x32xf32, #tpu.memory_space<vmem>>, vector<1x32xf32>
      %14 = vector.broadcast %13 : vector<1x32xf32> to vector<16x32xf32>
      %15 = arith.addf %12, %14 : vector<16x32xf32>
      %c0_14 = arith.constant 0 : index
      %c0_15 = arith.constant 0 : index
      %16 = vector.load %arg5[%c0_14, %c0_15] : memref<16x32xf32, #tpu.memory_space<vmem>>, vector<16x32xf32>
      %17 = arith.addf %15, %16 : vector<16x32xf32>
      %cst_16 = arith.constant dense<0.000000e+00> : vector<16xf32>
      %18 = vector.multi_reduction <add>, %17, %cst_16 [1] : vector<16x32xf32> to vector<16xf32>
      %19 = vector.shape_cast %18 : vector<16xf32> to vector<16x1xf32>
      %cst_17 = arith.constant 3.200000e+01 : f32
      %20 = vector.broadcast %cst_17 : f32 to vector<16x1xf32>
      %21 = arith.divf %19, %20 : vector<16x1xf32>
      %22 = vector.broadcast %21 : vector<16x1xf32> to vector<16x32xf32>
      %23 = arith.subf %17, %22 : vector<16x32xf32>
      %24 = vector.broadcast %21 : vector<16x1xf32> to vector<16x32xf32>
      %25 = arith.subf %17, %24 : vector<16x32xf32>
      %26 = arith.mulf %23, %25 : vector<16x32xf32>
      %cst_18 = arith.constant dense<0.000000e+00> : vector<16xf32>
      %27 = vector.multi_reduction <add>, %26, %cst_18 [1] : vector<16x32xf32> to vector<16xf32>
      %28 = vector.shape_cast %27 : vector<16xf32> to vector<16x1xf32>
      %cst_19 = arith.constant 3.200000e+01 : f32
      %29 = vector.broadcast %cst_19 : f32 to vector<16x1xf32>
      %30 = arith.divf %28, %29 : vector<16x1xf32>
      %31 = vector.broadcast %21 : vector<16x1xf32> to vector<16x32xf32>
      %32 = arith.subf %17, %31 : vector<16x32xf32>
      %cst_20 = arith.constant 9.99999996E-13 : f32
      %33 = vector.broadcast %cst_20 : f32 to vector<16x1xf32>
      %34 = arith.addf %30, %33 : vector<16x1xf32>
      %35 = math.rsqrt %34 : vector<16x1xf32>
      %36 = vector.broadcast %35 : vector<16x1xf32> to vector<16x32xf32>
      %37 = arith.mulf %32, %36 : vector<16x32xf32>
      %c0_21 = arith.constant 0 : index
      %c0_22 = arith.constant 0 : index
      %38 = vector.load %arg6[%c0_21, %c0_22] : memref<1x32xf32, #tpu.memory_space<vmem>>, vector<1x32xf32>
      %39 = vector.broadcast %38 : vector<1x32xf32> to vector<16x32xf32>
      %40 = arith.mulf %37, %39 : vector<16x32xf32>
      %c0_23 = arith.constant 0 : index
      %c0_24 = arith.constant 0 : index
      %41 = vector.load %arg7[%c0_23, %c0_24] : memref<1x32xf32, #tpu.memory_space<vmem>>, vector<1x32xf32>
      %42 = vector.broadcast %41 : vector<1x32xf32> to vector<16x32xf32>
      %43 = arith.addf %40, %42 : vector<16x32xf32>
      %c0_25 = arith.constant 0 : index
      %c0_26 = arith.constant 0 : index
      %44 = vector.load %arg8[%c0_25, %c0_26] : memref<16x32xf32, #tpu.memory_space<vmem>>, vector<16x32xf32>
      tpu.vector_store %arg8[%c0_25, %c0_26], %43 {strides = array<i32>} : memref<16x32xf32, #tpu.memory_space<vmem>>, vector<16x32xf32>,
    } else {
    }
    return
  }
  func.func @transform_0(%arg0: i32, %arg1: i32) -> (i32, i32) {
    %c0_i32 = arith.constant 0 : i32
    return %arg0, %arg1 : i32, i32
  }
  func.func @transform_1(%arg0: i32, %arg1: i32) -> (i32, i32) {
    %c0_i32 = arith.constant 0 : i32
    %c0_i32_0 = arith.constant 0 : i32
    return %arg1, %c0_i32 : i32, i32
  }
  func.func @transform_2(%arg0: i32, %arg1: i32) -> (i32, i32) {
    %c0_i32 = arith.constant 0 : i32
    %c0_i32_0 = arith.constant 0 : i32
    %c0_i32_1 = arith.constant 0 : i32
    return %c0_i32, %c0_i32_0 : i32, i32
  }
  func.func @transform_3(%arg0: i32, %arg1: i32) -> (i32, i32) {
    %c0_i32 = arith.constant 0 : i32
    %c0_i32_0 = arith.constant 0 : i32
    return %arg0, %c0_i32 : i32, i32
  }
  func.func @transform_4(%arg0: i32, %arg1: i32) -> (i32, i32) {
    %c0_i32 = arith.constant 0 : i32
    %c0_i32_0 = arith.constant 0 : i32
    %c0_i32_1 = arith.constant 0 : i32
    return %c0_i32, %c0_i32_0 : i32, i32
  }
  func.func @transform_5(%arg0: i32, %arg1: i32) -> (i32, i32) {
    %c0_i32 = arith.constant 0 : i32
    %c0_i32_0 = arith.constant 0 : i32
    %c0_i32_1 = arith.constant 0 : i32
    return %c0_i32, %c0_i32_0 : i32, i32
  }
  func.func @transform_6(%arg0: i32, %arg1: i32) -> (i32, i32) {
    %c0_i32 = arith.constant 0 : i32
    %c0_i32_0 = arith.constant 0 : i32
    return %arg0, %c0_i32 : i32, i32
  }
}

module attributes {stable_mosaic.version = 11 : i64} {
  func.func @_head_kernel(%arg0: i32, %arg1: memref<2x32xbf16, #tpu.memory_space<vmem>>, %arg2: memref<32x32xbf16, #tpu.memory_space<vmem>>, %arg3: memref<1x32xf32, #tpu.memory_space<vmem>>, %arg4: memref<32x128xbf16, #tpu.memory_space<vmem>>, %arg5: memref<1x128xf32, #tpu.memory_space<vmem>>, %arg6: memref<2x128xf32, #tpu.memory_space<vmem>>) attributes {dimension_semantics = [#tpu.dimension_semantics<arbitrary>], iteration_bounds = array<i64: 1>, scalar_prefetch = 0 : i64, scratch_operands = 0 : i64, tpu.core_type = #tpu.core_type<tc>, window_params = [{pipeline_mode = #tpu.pipeline_mode<synchronous>, transform_indices = @transform_0, window_bounds = array<i64: 2, 32>}, {pipeline_mode = #tpu.pipeline_mode<synchronous>, transform_indices = @transform_1, window_bounds = array<i64: 32, 32>}, {pipeline_mode = #tpu.pipeline_mode<synchronous>, transform_indices = @transform_2, window_bounds = array<i64: 1, 32>}, {pipeline_mode = #tpu.pipeline_mode<synchronous>, transform_indices = @transform_3, window_bounds = array<i64: 32, 128>}, {pipeline_mode = #tpu.pipeline_mode<synchronous>, transform_indices = @transform_4, window_bounds = array<i64: 1, 128>}, {pipeline_mode = #tpu.pipeline_mode<synchronous>, transform_indices = @transform_5, window_bounds = array<i64: 2, 128>}]} {
    %c0 = arith.constant 0 : index
    %c0_0 = arith.constant 0 : index
    %0 = vector.load %arg1[%c0, %c0_0] : memref<2x32xbf16, #tpu.memory_space<vmem>>, vector<2x32xbf16>
    %c0_1 = arith.constant 0 : index
    %c0_2 = arith.constant 0 : index
    %1 = vector.load %arg2[%c0_1, %c0_2] : memref<32x32xbf16, #tpu.memory_space<vmem>>, vector<32x32xbf16>
    %cst = arith.constant dense<0.000000e+00> : vector<2x32xf32>
    %2 = tpu.matmul %0, %1, %cst {dimension_numbers = #tpu.dot_dimension_numbers<[1], [0], [0], [1], [0, 0, 1, 1], [], []>} : vector<2x32xbf16>, vector<32x32xbf16>, vector<2x32xf32> -> vector<2x32xf32>
    %c0_3 = arith.constant 0 : index
    %c0_4 = arith.constant 0 : index
    %3 = vector.load %arg3[%c0_3, %c0_4] : memref<1x32xf32, #tpu.memory_space<vmem>>, vector<1x32xf32>
    %4 = vector.broadcast %3 : vector<1x32xf32> to vector<2x32xf32>
    %5 = arith.addf %2, %4 : vector<2x32xf32>
    %6 = arith.truncf %5 : vector<2x32xf32> to vector<2x32xbf16>
    %c0_5 = arith.constant 0 : index
    %c0_6 = arith.constant 0 : index
    %7 = vector.load %arg4[%c0_5, %c0_6] : memref<32x128xbf16, #tpu.memory_space<vmem>>, vector<32x128xbf16>
    %cst_7 = arith.constant dense<0.000000e+00> : vector<2x128xf32>
    %8 = tpu.matmul %6, %7, %cst_7 {dimension_numbers = #tpu.dot_dimension_numbers<[1], [0], [0], [1], [0, 0, 1, 1], [], []>} : vector<2x32xbf16>, vector<32x128xbf16>, vector<2x128xf32> -> vector<2x128xf32>
    %c0_8 = arith.constant 0 : index
    %c0_9 = arith.constant 0 : index
    %9 = vector.load %arg5[%c0_8, %c0_9] : memref<1x128xf32, #tpu.memory_space<vmem>>, vector<1x128xf32>
    %10 = vector.broadcast %9 : vector<1x128xf32> to vector<2x128xf32>
    %11 = arith.addf %8, %10 : vector<2x128xf32>
    %c0_10 = arith.constant 0 : index
    %c0_11 = arith.constant 0 : index
    %12 = vector.load %arg6[%c0_10, %c0_11] : memref<2x128xf32, #tpu.memory_space<vmem>>, vector<2x128xf32>
    tpu.vector_store %arg6[%c0_10, %c0_11], %11 {strides = array<i32>} : memref<2x128xf32, #tpu.memory_space<vmem>>, vector<2x128xf32>,
    return
  }
  func.func @transform_0(%arg0: i32) -> (i32, i32) {
    %c0_i32 = arith.constant 0 : i32
    %c0_i32_0 = arith.constant 0 : i32
    %c0_i32_1 = arith.constant 0 : i32
    return %c0_i32, %c0_i32_0 : i32, i32
  }
  func.func @transform_1(%arg0: i32) -> (i32, i32) {
    %c0_i32 = arith.constant 0 : i32
    %c0_i32_0 = arith.constant 0 : i32
    %c0_i32_1 = arith.constant 0 : i32
    return %c0_i32, %c0_i32_0 : i32, i32
  }
  func.func @transform_2(%arg0: i32) -> (i32, i32) {
    %c0_i32 = arith.constant 0 : i32
    %c0_i32_0 = arith.constant 0 : i32
    %c0_i32_1 = arith.constant 0 : i32
    return %c0_i32, %c0_i32_0 : i32, i32
  }
  func.func @transform_3(%arg0: i32) -> (i32, i32) {
    %c0_i32 = arith.constant 0 : i32
    %c0_i32_0 = arith.constant 0 : i32
    %c0_i32_1 = arith.constant 0 : i32
    return %c0_i32, %c0_i32_0 : i32, i32
  }
  func.func @transform_4(%arg0: i32) -> (i32, i32) {
    %c0_i32 = arith.constant 0 : i32
    %c0_i32_0 = arith.constant 0 : i32
    %c0_i32_1 = arith.constant 0 : i32
    return %c0_i32, %c0_i32_0 : i32, i32
  }
  func.func @transform_5(%arg0: i32) -> (i32, i32) {
    %c0_i32 = arith.constant 0 : i32
    %c0_i32_0 = arith.constant 0 : i32
    %c0_i32_1 = arith.constant 0 : i32
    return %c0_i32, %c0_i32_0 : i32, i32
  }
}

</mosaic_0001>

<bundles_post_ra>
// kernel: _logits_fn.13
= control target key start
LH: loop header
LB: loop body
LE: loop exit
PB: predicated region body
PF: predicated region fallthrough
CT: control target
= control target key end

     0   :  { %vm19_vm0 = vcmask 785408   ;;  %v108_v1 = vmov 0.0   ;;  %vm47_vm1 = vcmask 261120   ;;  %vm83_vm2 = vcmask 781312   ;;  %s151_s1 = inlined_call_operand.vmem [shape: bf16[32,96], index: 1, kind: input, shape index: {}]   ;;  %s152_s2 = inlined_call_operand.vmem [shape: f32[1,96], index: 2, kind: input, shape index: {}]   ;;  %s153_s0 = inlined_call_operand.vmem [shape: bf16[16,32], index: 0, kind: input, shape index: {}]   ;;  %s154_s3 = inlined_call_operand.vmem [shape: bf16[16,96], index: 3, kind: output, shape index: {}]  }
   0x1   :  { %v105_v0 = vld [vmem:[%s151_s1 + $0x8] sm:$0xff]  ;;  %20 = vst.msk [vmem:[#allocation2] sm:$0xff] %vm19_vm0, %v108_v1  ;;  %v104_v2 = vld [vmem:[%s151_s1] sm:$0xff] }
   0x2   :  { %21 = vst.msk [vmem:[#allocation2 + $0x8] sm:$0xff] %vm19_vm0, %v108_v1  ;;  %57 = vmatpush.bf16.msra.mxu0 %v105_v0  ;;  %v103_v3 = vld [vmem:[%s153_s0] sm:$0xff] }
   0x3   :  { %v107_v8 = vld [vmem:[%s152_s2] ss:$0 sm:$0xff] }
   0x6   :  { %58 = vmatpush.bf16.msra.mxu0 %v104_v2 }
   0x8   :  { %v22_v4 = vld [vmem:[#allocation2] sm:$0xff] }
   0x9   :  { %102 = vmatmul.msk.bf16.vlgmr.msra.gmra.mxu0 %vm47_vm1, %v103_v3  ;;  %v23_v7 = vld [vmem:[#allocation2 + $0x8] sm:$0xff] }
  0x86   :  { %v60_v5 = vpop.f32.mrf.mxu0 }
  0x87   :  { %v65_v6 = vadd.f32 %v60_v5, %v22_v4 }
  0x89   :  { %68 = vst.msk [vmem:[#allocation2] sm:$0xff] %vm19_vm0, %v65_v6 }
  0x8e   :  { %v62_v9 = vpop.f32.mrf.mxu0 }
  0x8f   :  { %v66_v10 = vadd.f32 %v62_v9, %v23_v7 }
  0x90   :  { %v73_v11 = vld [vmem:[#allocation2] sm:$0xff] }
  0x91   :  { %v79_v12 = vadd.f32 %v107_v8, %v73_v11  ;;  %69 = vst.msk [vmem:[#allocation2 + $0x8] sm:$0xff] %vm19_vm0, %v66_v10 }
  0x93   :  { %v81_v13 = vpack.c.bf16 %v79_v12, %v79_v12 }
  0x95   :  { %84 = vst.msk [vmem:[%s154_s3] sm:$0xf] %vm83_vm2, %v81_v13 }
  0x98   :  { %v74_v14 = vld [vmem:[#allocation2 + $0x8] sm:$0xff] }
  0x99   :  { %v80_v15 = vadd.f32 %v107_v8, %v74_v14 }
  0x9b   :  { %v82_v16 = vpack.c.bf16 %v80_v15, %v80_v15 }
  0x9d   :  { %85 = vst.msk [vmem:[%s154_s3 + $0x4] sm:$0xf] %vm83_vm2, %v82_v16 }

// kernel: _logits_fn.12
= control target key start
LH: loop header
LB: loop body
LE: loop exit
PB: predicated region body
PF: predicated region fallthrough
CT: control target
= control target key end

     0   :  { %vm16_vm0 = vcmask 261120   ;;  %v95_v4 = vmov 32.0   ;;  %s140_s0 = inlined_call_operand.vmem [shape: f32[16,32], index: 0, kind: input, shape index: {}]   ;;  %s141_s1 = inlined_call_operand.vmem [shape: f32[1,32], index: 1, kind: input, shape index: {}]   ;;  %s142_s2 = inlined_call_operand.vmem [shape: f32[1,32], index: 2, kind: input, shape index: {}]   ;;  %s143_s3 = inlined_call_operand.vmem [shape: f32[16,32], index: 3, kind: output, shape index: {}]  }
   0x1   :  { %v14_v0 = vld [vmem:[%s140_s0] sm:$0xff]  ;;  %v15_v2 = vld [vmem:[%s140_s0 + $0x8] sm:$0xff]  ;;  %89 = vrcp.f32 %v95_v4 }
   0x2   :  { %v17_v1 = vsel %vm16_vm0, %v14_v0, 0.0  ;;  %v20_v3 = vsel %vm16_vm0, %v15_v2, 0.0  ;;  %v87_v35 = vld [vmem:[%s141_s1] ss:$0 sm:$0xff] }
   0x3   :  { %18 = vadd.xlane.f32.xlu0 %v17_v1  ;;  %v88_v38 = vld [vmem:[%s142_s2] ss:$0 sm:$0xff] }
   0x7   :  { %v90_v5 = vpop.eup %89 }
   0x8   :  { %v24_v6 = vmul.f32 32.0, %v90_v5  ;;  %vm28_vm1 = vweird.f32 %v90_v5 }
   0xa   :  { %v25_v7 = vsub.f32 1.0, %v24_v6 }
   0xb   :  { %21 = vadd.xlane.f32.xlu0 %v20_v3 }
   0xc   :  { %v26_v8 = vmul.f32 %v90_v5, %v25_v7 }
   0xe   :  { %v27_v9 = vadd.f32 %v90_v5, %v26_v8 }
  0x10   :  { %v29_v10 = vsel %vm28_vm1, %v90_v5, %v27_v9 }
  0x76   :  { %v19_v11 = vpop.xlane.xlu0 %18 }
  0x77   :  { %v30_v12 = vmul.f32 %v29_v10, %v19_v11 }
  0x79   :  { %v32_v13 = vsub.f32 %v14_v0, %v30_v12 }
  0x7b   :  { %v34_v14 = vmul.f32 %v32_v13, %v32_v13 }
  0x7d   :  { %v36_v15 = vsel %vm16_vm0, %v34_v14, 0.0 }
  0x7e   :  { %37 = vadd.xlane.f32.xlu1 %v36_v15  ;;  %v22_v16 = vpop.xlane.xlu0 %21 }
  0x7f   :  { %v31_v17 = vmul.f32 %v29_v10, %v22_v16 }
  0x81   :  { %v33_v18 = vsub.f32 %v15_v2, %v31_v17 }
  0x83   :  { %v35_v19 = vmul.f32 %v33_v18, %v33_v18 }
  0x85   :  { %v39_v20 = vsel %vm16_vm0, %v35_v19, 0.0 }
  0x86   :  { %40 = vadd.xlane.f32.xlu1 %v39_v20 }
  0xf1   :  { %v38_v21 = vpop.xlane.xlu1 %37 }
  0xf2   :  { %v42_v22 = vmul.f32 %v38_v21, %v29_v10 }
  0xf4   :  { %v44_v23 = vadd.f32 1e-12, %v42_v22 }
  0xf6   :  { %91 = vrsqrt.f32 %v44_v23  ;;  %vm52_vm3 = vweird.f32 %v44_v23 }
  0xf9   :  { %v41_v24 = vpop.xlane.xlu1 %40 }
  0xfa   :  { %v43_v25 = vmul.f32 %v41_v24, %v29_v10 }
  0xfc   :  { %v92_v26 = vpop.eup %91  ;;  %v45_v27 = vadd.f32 1e-12, %v43_v25 }
  0xfd   :  { %v47_v28 = vmul.f32 %v92_v26, %v44_v23  ;;  %vm53_vm2 = vweird.f32 %v92_v26 }
  0xfe   :  { %93 = vrsqrt.f32 %v45_v27  ;;  %vm54_vm4 = vmor %vm52_vm3, %vm53_vm2  ;;  %vm62_vm6 = vweird.f32 %v45_v27 }
  0xff   :  { %v48_v29 = vmul.f32 %v92_v26, %v47_v28 }
 0x101   :  { %v49_v30 = vmul.f32 0.5, %v48_v29 }
 0x103   :  { %v50_v31 = vsub.f32 1.5, %v49_v30 }
 0x104   :  { %v94_v32 = vpop.eup %93 }
 0x105   :  { %v51_v33 = vmul.f32 %v92_v26, %v50_v31  ;;  %v57_v34 = vmul.f32 %v94_v32, %v45_v27  ;;  %vm63_vm5 = vweird.f32 %v94_v32 }
 0x106   :  { %vm64_vm7 = vmor %vm62_vm6, %vm63_vm5 }
 0x107   :  { %v55_v36 = vsel %vm54_vm4, %v92_v26, %v51_v33  ;;  %v58_v37 = vmul.f32 %v94_v32, %v57_v34 }
 0x108   :  { %v66_v39 = vmul.f32 %v55_v36, %v32_v13 }
 0x109   :  { %v59_v40 = vmul.f32 0.5, %v58_v37 }
 0x10a   :  { %v72_v41 = vmul.f32 %v87_v35, %v66_v39 }
 0x10b   :  { %v60_v42 = vsub.f32 1.5, %v59_v40 }
 0x10c   :  { %v78_v43 = vadd.f32 %v88_v38, %v72_v41 }
 0x10d   :  { %v61_v44 = vmul.f32 %v94_v32, %v60_v42 }
 0x10e   :  { %80 = vst.msk [vmem:[%s143_s3] sm:$0xff] %vm16_vm0, %v78_v43 }
 0x10f   :  { %v65_v45 = vsel %vm64_vm7, %v94_v32, %v61_v44 }
 0x110   :  { %v67_v46 = vmul.f32 %v65_v45, %v33_v18 }
 0x112   :  { %v73_v47 = vmul.f32 %v87_v35, %v67_v46 }
 0x114   :  { %v79_v48 = vadd.f32 %v88_v38, %v73_v47 }
 0x116   :  { %81 = vst.msk [vmem:[%s143_s3 + $0x8] sm:$0xff] %vm16_vm0, %v79_v48 }

// kernel: _logits_fn.15
= control target key start
LH: loop header
LB: loop body
LE: loop exit
PB: predicated region body
PF: predicated region fallthrough
CT: control target
= control target key end

     0   :  { %vm28_vm0 = vcmask 261120   ;;  %v189_v1 = vmov 0.0   ;;  %v190_v21 = vmov 32.0   ;;  %s267_s1 = inlined_call_operand.vmem [shape: bf16[32,32], index: 1, kind: input, shape index: {}]   ;;  %s268_s0 = inlined_call_operand.vmem [shape: bf16[16,32], index: 0, kind: input, shape index: {}]   ;;  %s269_s2 = inlined_call_operand.vmem [shape: f32[1,32], index: 2, kind: input, shape index: {}]   ;;  %s270_s3 = inlined_call_operand.vmem [shape: f32[16,32], index: 3, kind: input, shape index: {}]   ;;  %s271_s4 = inlined_call_operand.vmem [shape: f32[1,32], index: 4, kind: input, shape index: {}]   ;;  %s272_s5 = inlined_call_operand.vmem [shape: f32[1,32], index: 5, kind: input, shape index: {}]   ;;  %s273_s6 = inlined_call_operand.vmem [shape: f32[16,32], index: 6, kind: output, shape index: {}]  }
   0x1   :  { %v177_v0 = vld [vmem:[%s267_s1 + $0x8] sm:$0xff]  ;;  %29 = vst.msk [vmem:[#allocation2] sm:$0xff] %vm28_vm0, %v189_v1  ;;  %v176_v2 = vld [vmem:[%s267_s1] sm:$0xff]  ;;  %183 = vrcp.f32 %v190_v21 }
   0x2   :  { %30 = vst.msk [vmem:[#allocation2 + $0x8] sm:$0xff] %vm28_vm0, %v189_v1  ;;  %66 = vmatpush.bf16.msra.mxu0 %v177_v0  ;;  %v175_v3 = vld [vmem:[%s268_s0] sm:$0xff]  ;;  %v90_v17 = vld [vmem:[%s270_s3 + $0x8] sm:$0xff] }
   0x3   :  { %v180_v8 = vld [vmem:[%s269_s2] ss:$0 sm:$0xff] }
   0x4   :  { %v89_v12 = vld [vmem:[%s270_s3] sm:$0xff] }
   0x5   :  { %v181_v52 = vld [vmem:[%s271_s4] ss:$0 sm:$0xff] }
   0x6   :  { %67 = vmatpush.bf16.msra.mxu0 %v176_v2  ;;  %v182_v55 = vld [vmem:[%s272_s5] ss:$0 sm:$0xff] }
   0x7   :  { %v184_v22 = vpop.eup %183 }
   0x8   :  { %v31_v4 = vld [vmem:[#allocation2] sm:$0xff]  ;;  %v100_v23 = vmul.f32 32.0, %v184_v22  ;;  %vm104_vm1 = vweird.f32 %v184_v22 }
   0x9   :  { %174 = vmatmul.msk.bf16.vlgmr.msra.gmra.mxu0 %vm28_vm0, %v175_v3  ;;  %v32_v7 = vld [vmem:[#allocation2 + $0x8] sm:$0xff] }
   0xa   :  { %v101_v24 = vsub.f32 1.0, %v100_v23 }
   0xc   :  { %v102_v25 = vmul.f32 %v184_v22, %v101_v24 }
   0xe   :  { %v103_v26 = vadd.f32 %v184_v22, %v102_v25 }
  0x10   :  { %v105_v27 = vsel %vm104_vm1, %v184_v22, %v103_v26 }
  0x86   :  { %v69_v5 = vpop.f32.mrf.mxu0 }
  0x87   :  { %v74_v6 = vadd.f32 %v69_v5, %v31_v4 }
  0x89   :  { %76 = vst.msk [vmem:[#allocation2] sm:$0xff] %vm28_vm0, %v74_v6 }
  0x8e   :  { %v71_v9 = vpop.f32.mrf.mxu0 }
  0x8f   :  { %v75_v10 = vadd.f32 %v71_v9, %v32_v7 }
  0x90   :  { %v81_v11 = vld [vmem:[#allocation2] sm:$0xff] }
  0x91   :  { %77 = vst.msk [vmem:[#allocation2 + $0x8] sm:$0xff] %vm28_vm0, %v75_v10  ;;  %v87_v13 = vadd.f32 %v180_v8, %v81_v11 }
  0x93   :  { %v91_v14 = vadd.f32 %v89_v12, %v87_v13 }
  0x95   :  { %v93_v15 = vsel %vm28_vm0, %v91_v14, 0.0 }
  0x96   :  { %94 = vadd.xlane.f32.xlu0 %v93_v15 }
  0x98   :  { %v82_v16 = vld [vmem:[#allocation2 + $0x8] sm:$0xff] }
  0x99   :  { %v88_v18 = vadd.f32 %v180_v8, %v82_v16 }
  0x9b   :  { %v92_v19 = vadd.f32 %v90_v17, %v88_v18 }
  0x9d   :  { %v96_v20 = vsel %vm28_vm0, %v92_v19, 0.0 }
  0x9e   :  { %97 = vadd.xlane.f32.xlu0 %v96_v20 }
 0x109   :  { %v95_v28 = vpop.xlane.xlu0 %94 }
 0x10a   :  { %v106_v29 = vmul.f32 %v105_v27, %v95_v28 }
 0x10c   :  { %v108_v30 = vsub.f32 %v91_v14, %v106_v29 }
 0x10e   :  { %v110_v31 = vmul.f32 %v108_v30, %v108_v30 }
 0x110   :  { %v112_v32 = vsel %vm28_vm0, %v110_v31, 0.0 }
 0x111   :  { %113 = vadd.xlane.f32.xlu1 %v112_v32  ;;  %v98_v33 = vpop.xlane.xlu0 %97 }
 0x112   :  { %v107_v34 = vmul.f32 %v105_v27, %v98_v33 }
 0x114   :  { %v109_v35 = vsub.f32 %v92_v19, %v107_v34 }
 0x116   :  { %v111_v36 = vmul.f32 %v109_v35, %v109_v35 }
 0x118   :  { %v115_v37 = vsel %vm28_vm0, %v111_v36, 0.0 }
 0x119   :  { %116 = vadd.xlane.f32.xlu1 %v115_v37 }
 0x184   :  { %v114_v38 = vpop.xlane.xlu1 %113 }
 0x185   :  { %v118_v39 = vmul.f32 %v114_v38, %v105_v27 }
 0x187   :  { %v120_v40 = vadd.f32 1e-12, %v118_v39 }
 0x189   :  { %185 = vrsqrt.f32 %v120_v40  ;;  %vm128_vm3 = vweird.f32 %v120_v40 }
 0x18c   :  { %v117_v41 = vpop.xlane.xlu1 %116 }
 0x18d   :  { %v119_v42 = vmul.f32 %v117_v41, %v105_v27 }
 0x18f   :  { %v186_v43 = vpop.eup %185  ;;  %v121_v44 = vadd.f32 1e-12, %v119_v42 }
 0x190   :  { %v123_v45 = vmul.f32 %v186_v43, %v120_v40  ;;  %vm129_vm2 = vweird.f32 %v186_v43 }
 0x191   :  { %187 = vrsqrt.f32 %v121_v44  ;;  %vm130_vm4 = vmor %vm128_vm3, %vm129_vm2  ;;  %vm138_vm6 = vweird.f32 %v121_v44 }
 0x192   :  { %v124_v46 = vmul.f32 %v186_v43, %v123_v45 }
 0x194   :  { %v125_v47 = vmul.f32 0.5, %v124_v46 }
 0x196   :  { %v126_v48 = vsub.f32 1.5, %v125_v47 }
 0x197   :  { %v188_v49 = vpop.eup %187 }
 0x198   :  { %v127_v50 = vmul.f32 %v186_v43, %v126_v48  ;;  %v133_v51 = vmul.f32 %v188_v49, %v121_v44  ;;  %vm139_vm5 = vweird.f32 %v188_v49 }
 0x199   :  { %vm140_vm7 = vmor %vm138_vm6, %vm139_vm5 }
 0x19a   :  { %v131_v53 = vsel %vm130_vm4, %v186_v43, %v127_v50  ;;  %v134_v54 = vmul.f32 %v188_v49, %v133_v51 }
 0x19b   :  { %v142_v56 = vmul.f32 %v131_v53, %v108_v30 }
 0x19c   :  { %v135_v57 = vmul.f32 0.5, %v134_v54 }
 0x19d   :  { %v148_v58 = vmul.f32 %v181_v52, %v142_v56 }
 0x19e   :  { %v136_v59 = vsub.f32 1.5, %v135_v57 }
 0x19f   :  { %v154_v60 = vadd.f32 %v182_v55, %v148_v58 }
 0x1a0   :  { %v137_v61 = vmul.f32 %v188_v49, %v136_v59 }
 0x1a1   :  { %156 = vst.msk [vmem:[%s273_s6] sm:$0xff] %vm28_vm0, %v154_v60 }
 0x1a2   :  { %v141_v62 = vsel %vm140_vm7, %v188_v49, %v137_v61 }
 0x1a3   :  { %v143_v63 = vmul.f32 %v141_v62, %v109_v35 }
 0x1a5   :  { %v149_v0 = vmul.f32 %v181_v52, %v143_v63 }
 0x1a7   :  { %v155_v1 = vadd.f32 %v182_v55, %v149_v0 }
 0x1a9   :  { %157 = vst.msk [vmem:[%s273_s6 + $0x8] sm:$0xff] %vm28_vm0, %v155_v1 }

// kernel: _logits_fn.14
= control target key start
LH: loop header
LB: loop body
LE: loop exit
PB: predicated region body
PF: predicated region fallthrough
CT: control target
= control target key end

     0   :  { %vm39_vm0 = vcmask 64512   ;;  %vm22_vm1 = vcmask 7168   ;;  %v873_v34 = vmov -1e+30   ;;  %vm525_vm2 = vcmask 1043456   ;;  %s1210_s1 = inlined_call_operand.vmem [shape: bf16[8,8,8], index: 1, kind: input, shape index: {}]   ;;  %s1211_s0 = inlined_call_operand.vmem [shape: bf16[8,8,8], index: 0, kind: input, shape index: {}]   ;;  %s1212_s3 = inlined_call_operand.vmem [shape: f32[8,1,8], index: 3, kind: input, shape index: {}]   ;;  %s1213_s2 = inlined_call_operand.vmem [shape: bf16[8,8,8], index: 2, kind: input, shape index: {}]   ;;  %s1214_s4 = inlined_call_operand.vmem [shape: bf16[8,8,8], index: 4, kind: output, shape index: {}]  }
   0x1   :  { %v56_v0 = vld [vmem:[%s1210_s1] sm:$0xf]  ;;  %v58_v1 = vld [vmem:[%s1210_s1 + $0x8] sm:$0xf]  ;;  %v59_v2 = vld [vmem:[%s1210_s1 + $0xc] sm:$0xf] }
   0x2   :  { %v69_v3 = vsel %vm39_vm0, %v56_v0, 0  ;;  %v107_v4 = vsel %vm39_vm0, %v58_v1, 0  ;;  %v126_v5 = vsel %vm39_vm0, %v59_v2, 0  ;;  %v62_v6 = vld [vmem:[%s1210_s1 + $0x18] sm:$0xf]  ;;  %23 = vst.msk [vmem:[#allocation2] sm:$0xff] %vm22_vm1, %v873_v34 }
   0x3   :  { %78 = vmatpush.bf16.xpose.msra.mxu0 %v69_v3  ;;  %116 = vmatpush.bf16.xpose.msra.mxu2 %v107_v4  ;;  %v183_v7 = vsel %vm39_vm0, %v62_v6, 0  ;;  %v57_v8 = vld [vmem:[%s1210_s1 + $0x4] sm:$0xf]  ;;  %v63_v9 = vld [vmem:[%s1210_s1 + $0x1c] sm:$0xf]  ;;  %24 = vst.msk [vmem:[#allocation2 + $0x8] sm:$0xff] %vm22_vm1, %v873_v34 }
   0x4   :  { %135 = vmatpush.bf16.xpose.msra.mxu3 %v126_v5  ;;  %v88_v10 = vsel %vm39_vm0, %v57_v8, 0  ;;  %v202_v11 = vsel %vm39_vm0, %v63_v9, 0  ;;  %v61_v12 = vld [vmem:[%s1210_s1 + $0x14] sm:$0xf]  ;;  %v60_v13 = vld [vmem:[%s1210_s1 + $0x10] sm:$0xf] }
   0x5   :  { %97 = vmatpush.bf16.xpose.msra.mxu1 %v88_v10  ;;  %v48_v14 = vld [vmem:[%s1211_s0] sm:$0xf]  ;;  %v50_v15 = vld [vmem:[%s1211_s0 + $0x8] sm:$0xf]  ;;  %v164_v16 = vsel %vm39_vm0, %v61_v12, 0  ;;  %v145_v17 = vsel %vm39_vm0, %v60_v13, 0 }
   0x6   :  { %v51_v18 = vld [vmem:[%s1211_s0 + $0xc] sm:$0xf]  ;;  %v49_v19 = vld [vmem:[%s1211_s0 + $0x4] sm:$0xf]  ;;  %v54_v20 = vld [vmem:[%s1211_s0 + $0x18] sm:$0xf] }
   0x7   :  { %v52_v21 = vld [vmem:[%s1211_s0 + $0x10] sm:$0xf]  ;;  %v55_v22 = vld [vmem:[%s1211_s0 + $0x1c] sm:$0xf]  ;;  %v53_v23 = vld [vmem:[%s1211_s0 + $0x14] sm:$0xf] }
   0x8   :  { %v817_v24 = vld [vmem:[%s1212_s3] ss:$0 sm:$0xff]  ;;  %v820_v29 = vld [vmem:[%s1212_s3 + $0x1] ss:$0 sm:$0xff]  ;;  %v818_v32 = vld [vmem:[%s1212_s3 + $0x2] ss:$0 sm:$0xff] }
   0x9   :  { %25 = vst.msk [vmem:[#allocation2 + $0x10] sm:$0xff] %vm22_vm1, %v873_v34  ;;  %v819_v41 = vld [vmem:[%s1212_s3 + $0x3] ss:$0 sm:$0xff]  ;;  %v823_v51 = vld [vmem:[%s1212_s3 + $0x4] ss:$0 sm:$0xff]  ;;  %v874_v9 = vmov 0  }
   0xa   :  { %795 = vmatmul.msk.bf16.vlgmr.msra.gmra.mxu0 %vm39_vm0, %v48_v14  ;;  %797 = vmatmul.msk.bf16.vlgmr.msra.gmra.mxu2 %vm39_vm0, %v50_v15  ;;  %26 = vst.msk [vmem:[#allocation2 + $0x18] sm:$0xff] %vm22_vm1, %v873_v34  ;;  %v824_v52 = vld [vmem:[%s1212_s3 + $0x5] ss:$0 sm:$0xff]  ;;  %v821_v55 = vld [vmem:[%s1212_s3 + $0x6] ss:$0 sm:$0xff]  ;;  %v875_v10 = vmov 0.0  }
   0xb   :  { %192 = vmatpush.bf16.xpose.msrb.mxu2 %v183_v7  ;;  %154 = vmatpush.bf16.xpose.msrb.mxu0 %v145_v17  ;;  %27 = vst.msk [vmem:[#allocation2 + $0x20] sm:$0xff] %vm22_vm1, %v873_v34  ;;  %v822_v1 = vld [vmem:[%s1212_s3 + $0x7] ss:$0 sm:$0xff]  ;;  %vm782_vm3 = vcmask 60416  }
   0xc   :  { %211 = vmatpush.bf16.xpose.msrb.mxu3 %v202_v11  ;;  %796 = vmatmul.msk.bf16.vlgmr.msra.gmra.mxu1 %vm39_vm0, %v49_v19  ;;  %28 = vst.msk [vmem:[#allocation2 + $0x28] sm:$0xff] %vm22_vm1, %v873_v34  ;;  %v265_v11 = vld [vmem:[#allocation2] sm:$0xff] }
   0xd   :  { %173 = vmatpush.bf16.xpose.msrb.mxu1 %v164_v16  ;;  %798 = vmatmul.msk.bf16.vlgmr.msra.gmra.mxu3 %vm39_vm0, %v51_v18  ;;  %29 = vst.msk [vmem:[#allocation2 + $0x30] sm:$0xff] %vm22_vm1, %v873_v34  ;;  %v266_v16 = vld [vmem:[#allocation2 + $0x8] sm:$0xff] }
   0xe   :  { %30 = vst.msk [vmem:[#allocation2 + $0x38] sm:$0xff] %vm22_vm1, %v873_v34  ;;  %816 = vset.pattern.permute.xlu1 %v874_v9  ;;  %814 = vset.pattern.permute.xlu2 %v874_v9 }
   0xf   :  { %815 = vset.pattern.permute.xlu0 %v874_v9  ;;  %41 = vst.msk [vmem:[#allocation4 + $0x8] sm:$0xff] %vm39_vm0, %v875_v10 }
  0x10   :  { %31 = vst.msk [vmem:[#allocation3] sm:$0xff] %vm22_vm1, %v875_v10  ;;  %v267_v14 = vld [vmem:[#allocation2 + $0x10] sm:$0xff] }
  0x11   :  { %32 = vst.msk [vmem:[#allocation3 + $0x8] sm:$0xff] %vm22_vm1, %v875_v10 }
  0x12   :  { %33 = vst.msk [vmem:[#allocation3 + $0x10] sm:$0xff] %vm22_vm1, %v875_v10 }
  0x13   :  { %34 = vst.msk [vmem:[#allocation3 + $0x18] sm:$0xff] %vm22_vm1, %v875_v10 }
  0x14   :  { %35 = vst.msk [vmem:[#allocation3 + $0x20] sm:$0xff] %vm22_vm1, %v875_v10 }
  0x15   :  { %36 = vst.msk [vmem:[#allocation3 + $0x28] sm:$0xff] %vm22_vm1, %v875_v10 }
  0x16   :  { %37 = vst.msk [vmem:[#allocation3 + $0x30] sm:$0xff] %vm22_vm1, %v875_v10 }
  0x17   :  { %38 = vst.msk [vmem:[#allocation3 + $0x38] sm:$0xff] %vm22_vm1, %v875_v10 }
  0x18   :  { %40 = vst.msk [vmem:[#allocation4] sm:$0xff] %vm39_vm0, %v875_v10 }
  0x19   :  { %42 = vst.msk [vmem:[#allocation4 + $0x10] sm:$0xff] %vm39_vm0, %v875_v10 }
  0x1a   :  { %801 = vmatmul.msk.bf16.vlgmr.msrb.gmra.mxu2 %vm39_vm0, %v54_v20  ;;  %799 = vmatmul.msk.bf16.vlgmr.msrb.gmra.mxu0 %vm39_vm0, %v52_v21  ;;  %43 = vst.msk [vmem:[#allocation4 + $0x18] sm:$0xff] %vm39_vm0, %v875_v10  ;;  %v268_v21 = vld [vmem:[#allocation2 + $0x18] sm:$0xff] }
  0x1b   :  { %44 = vst.msk [vmem:[#allocation4 + $0x20] sm:$0xff] %vm39_vm0, %v875_v10 }
  0x1c   :  { %800 = vmatmul.msk.bf16.vlgmr.msrb.gmra.mxu1 %vm39_vm0, %v53_v23  ;;  %45 = vst.msk [vmem:[#allocation4 + $0x28] sm:$0xff] %vm39_vm0, %v875_v10 }
  0x1d   :  { %802 = vmatmul.msk.bf16.vlgmr.msrb.gmra.mxu3 %vm39_vm0, %v55_v22  ;;  %46 = vst.msk [vmem:[#allocation4 + $0x30] sm:$0xff] %vm39_vm0, %v875_v10 }
  0x1e   :  { %47 = vst.msk [vmem:[#allocation4 + $0x38] sm:$0xff] %vm39_vm0, %v875_v10 }
  0x87   :  { %v80_v25 = vpop.f32.mrf.mxu0 }
  0x88   :  { %v217_v26 = vmul.f32 0.35355338, %v80_v25  ;;  %v270_v25 = vld [vmem:[#allocation2 + $0x28] sm:$0xff] }
  0x89   :  { %v99_v28 = vpop.f32.mrf.mxu1 }
  0x8a   :  { %v968_v27 = vadd.f32 %v817_v24, %v217_v26  ;;  %v218_v30 = vmul.f32 0.35355338, %v99_v28  ;;  %v271_v28 = vld [vmem:[#allocation2 + $0x30] sm:$0xff] }
  0x8c   :  { %v273_v31 = vsel %vm39_vm0, %v968_v27, -inf  ;;  %v979_v37 = vadd.f32 %v820_v29, %v218_v30  ;;  %v269_v29 = vld [vmem:[#allocation2 + $0x20] sm:$0xff] }
  0x8d   :  { %v118_v33 = vpop.f32.mrf.mxu2  ;;  %274 = vmax.xlane.f32.xlu1 %v273_v31 }
  0x8e   :  { %v219_v35 = vmul.f32 0.35355338, %v118_v33  ;;  %v276_v43 = vsel %vm39_vm0, %v979_v37, -inf }
  0x8f   :  { %v82_v38 = vpop.f32.mrf.mxu0 }
  0x90   :  { %v137_v36 = vpop.f32.mrf.mxu3  ;;  %v983_v40 = vadd.f32 %v818_v32, %v219_v35 }
  0x91   :  { %v220_v39 = vmul.f32 0.35355338, %v137_v36  ;;  %v101_v44 = vpop.f32.mrf.mxu1 }
  0x92   :  { %v279_v42 = vsel %vm39_vm0, %v983_v40, -inf }
  0x93   :  { %280 = vmax.xlane.f32.xlu0 %v279_v42  ;;  %v996_v45 = vadd.f32 %v819_v41, %v220_v39  ;;  %v1055_v41 = vld [vmem:[#allocation2 + $0x38] sm:$0xff] }
  0x95   :  { %v120_v46 = vpop.f32.mrf.mxu2  ;;  %277 = vmax.xlane.f32.xlu1 %v276_v43  ;;  %v282_v49 = vsel %vm39_vm0, %v996_v45, -inf }
  0x97   :  { %v156_v48 = vpop.f32.mrf.mxu0 }
  0x98   :  { %v139_v47 = vpop.f32.mrf.mxu3  ;;  %v221_v50 = vmul.f32 0.35355338, %v156_v48 }
  0x99   :  { %v175_v53 = vpop.f32.mrf.mxu1 }
  0x9a   :  { %v222_v54 = vmul.f32 0.35355338, %v175_v53  ;;  %v1010_v56 = vadd.f32 %v823_v51, %v221_v50 }
  0x9b   :  { %283 = vmax.xlane.f32.xlu0 %v282_v49 }
  0x9c   :  { %v1012_v58 = vadd.f32 %v824_v52, %v222_v54  ;;  %v285_v2 = vsel %vm39_vm0, %v1010_v56, -inf }
  0x9d   :  { %v194_v57 = vpop.f32.mrf.mxu2 }
  0x9e   :  { %v223_v59 = vmul.f32 0.35355338, %v194_v57  ;;  %v288_v61 = vsel %vm39_vm0, %v1012_v58, -inf }
  0x9f   :  { %v158_v62 = vpop.f32.mrf.mxu0  ;;  %289 = vmax.xlane.f32.xlu1 %v288_v61 }
  0xa0   :  { %v213_v60 = vpop.f32.mrf.mxu3  ;;  %v1016_v0 = vadd.f32 %v821_v55, %v223_v59 }
  0xa1   :  { %v224_v63 = vmul.f32 0.35355338, %v213_v60  ;;  %v177_v4 = vpop.f32.mrf.mxu1 }
  0xa2   :  { %v291_v3 = vsel %vm39_vm0, %v1016_v0, -inf  ;;  %v520_v4 = vld [vmem:[%s1213_s2 + $0x18] sm:$0xf] }
  0xa3   :  { %292 = vmax.xlane.f32.xlu2 %v291_v3  ;;  %286 = vmax.xlane.f32.xlu0 %v285_v2  ;;  %v1025_v5 = vadd.f32 %v822_v1, %v224_v63  ;;  %v516_v63 = vld [vmem:[%s1213_s2 + $0x8] sm:$0xf]  ;;  %v515_v2 = vld [vmem:[%s1213_s2 + $0x4] sm:$0xf] }
  0xa4   :  { %v565_v1 = vsel %vm525_vm2, %v516_v63, 0  ;;  %v546_v3 = vsel %vm525_vm2, %v515_v2, 0 }
  0xa5   :  { %v196_v6 = vpop.f32.mrf.mxu2  ;;  %v294_v8 = vsel %vm39_vm0, %v1025_v5, -inf  ;;  %574 = vmatpush.bf16.msra.mxu2 %v565_v1  ;;  %555 = vmatpush.bf16.msra.mxu1 %v546_v3 }
  0xa6   :  { %v641_v6 = vsel %vm525_vm2, %v520_v4, 0 }
  0xa8   :  { %v215_v7 = vpop.f32.mrf.mxu3 }
  0xa9   :  { %650 = vmatpush.bf16.msrb.mxu2 %v641_v6  ;;  %v514_v7 = vld [vmem:[%s1213_s2] sm:$0xf] }
  0xab   :  { %295 = vmax.xlane.f32.xlu2 %v294_v8  ;;  %v527_v8 = vsel %vm525_vm2, %v514_v7, 0 }
  0xac   :  { %536 = vmatpush.bf16.msra.mxu0 %v527_v8 }
 0x100   :  { %v275_v12 = vpop.xlane.xlu1 %274 }
 0x101   :  { %v297_v13 = vmax.f32 %v265_v11, %v275_v12 }
 0x103   :  { %691 = vst.msk [vmem:[#allocation2] sm:$0xff] %vm22_vm1, %v297_v13  ;;  %331 = vperm.xlu1 %816, %v297_v13   ;;  %v305_v48 = vsub.f32 %v265_v11, %v297_v13 }
 0x105   :  { %v313_v51 = vmul.f32 1.442695, %v305_v48 }
 0x106   :  { %v281_v15 = vpop.xlane.xlu0 %280 }
 0x107   :  { %v299_v17 = vmax.f32 %v267_v14, %v281_v15 }
 0x108   :  { %v278_v18 = vpop.xlane.xlu1 %277 }
 0x109   :  { %693 = vst.msk [vmem:[#allocation2 + $0x10] sm:$0xff] %vm22_vm1, %v299_v17  ;;  %341 = vperm.xlu2 %814, %v299_v17   ;;  %v298_v19 = vmax.f32 %v266_v16, %v278_v18  ;;  %v307_v20 = vsub.f32 %v267_v14, %v299_v17  ;;  %v517_v14 = vld [vmem:[%s1213_s2 + $0xc] sm:$0xf] }
 0x10a   :  { %v584_v17 = vsel %vm525_vm2, %v517_v14, 0 }
 0x10b   :  { %692 = vst.msk [vmem:[#allocation2 + $0x8] sm:$0xff] %vm22_vm1, %v298_v19  ;;  %v317_v22 = vmul.f32 1.442695, %v307_v20  ;;  %v306_v38 = vsub.f32 %v266_v16, %v298_v19  ;;  %593 = vmatpush.bf16.msra.mxu3 %v584_v17  ;;  %v395_v17 = vld [vmem:[#allocation3 + $0x10] sm:$0xff] }
 0x10d   :  { %825 = vpow2.f32 %v317_v22  ;;  %v315_v42 = vmul.f32 1.442695, %v306_v38 }
 0x10e   :  { %v284_v23 = vpop.xlane.xlu0 %283 }
 0x10f   :  { %v300_v24 = vmax.f32 %v268_v21, %v284_v23 }
 0x111   :  { %694 = vst.msk [vmem:[#allocation2 + $0x18] sm:$0xff] %vm22_vm1, %v300_v24  ;;  %336 = vperm.xlu2 %814, %v298_v19   ;;  %346 = vperm.xlu0 %815, %v300_v24   ;;  %v308_v53 = vsub.f32 %v268_v21, %v300_v24 }
 0x112   :  { %v290_v26 = vpop.xlane.xlu1 %289 }
 0x113   :  { %v302_v30 = vmax.f32 %v270_v25, %v290_v26  ;;  %v1050_v35 = vpop.eup %825  ;;  %v319_v55 = vmul.f32 1.442695, %v308_v53 }
 0x115   :  { %696 = vst.msk [vmem:[#allocation2 + $0x28] sm:$0xff] %vm22_vm1, %v302_v30  ;;  %v310_v46 = vsub.f32 %v270_v25, %v302_v30 }
 0x116   :  { %v293_v31 = vpop.xlane.xlu2 %292  ;;  %v287_v32 = vpop.xlane.xlu0 %286 }
 0x117   :  { %v303_v33 = vmax.f32 %v271_v28, %v293_v31  ;;  %v301_v34 = vmax.f32 %v269_v29, %v287_v32  ;;  %v323_v50 = vmul.f32 1.442695, %v310_v46 }
 0x119   :  { %697 = vst.msk [vmem:[#allocation2 + $0x30] sm:$0xff] %vm22_vm1, %v303_v33  ;;  %361 = vperm.xlu2 %814, %v303_v33   ;;  %470 = vperm.xlu0 %815, %v1050_v35   ;;  %v309_v36 = vsub.f32 %v269_v29, %v301_v34  ;;  %v311_v59 = vsub.f32 %v271_v28, %v303_v33 }
 0x11a   :  { %695 = vst.msk [vmem:[#allocation2 + $0x20] sm:$0xff] %vm22_vm1, %v301_v34 }
 0x11b   :  { %v321_v39 = vmul.f32 1.442695, %v309_v36  ;;  %v325_v60 = vmul.f32 1.442695, %v311_v59 }
 0x11d   :  { %827 = vpow2.f32 %v321_v39 }
 0x11e   :  { %v296_v43 = vpop.xlane.xlu2 %295  ;;  %829 = vpow2.f32 %v315_v42 }
 0x11f   :  { %v1058_v44 = vmax.f32 %v1055_v41, %v296_v43  ;;  %831 = vpow2.f32 %v323_v50  ;;  %v519_v43 = vld [vmem:[%s1213_s2 + $0x14] sm:$0xf] }
 0x120   :  { %833 = vpow2.f32 %v313_v51  ;;  %v622_v50 = vsel %vm525_vm2, %v519_v43, 0 }
 0x121   :  { %v312_v47 = vsub.f32 %v1055_v41, %v1058_v44  ;;  %698 = vst.msk [vmem:[#allocation2 + $0x38] sm:$0xff] %vm22_vm1, %v1058_v44  ;;  %366 = vperm.xlu1 %816, %v1058_v44   ;;  %351 = vperm.xlu2 %814, %v301_v34   ;;  %835 = vpow2.f32 %v319_v55 }
 0x122   :  { %837 = vpow2.f32 %v325_v60  ;;  %631 = vmatpush.bf16.msrb.mxu1 %v622_v50  ;;  %v396_v50 = vld [vmem:[#allocation3 + $0x18] sm:$0xff] }
 0x123   :  { %v1065_v49 = vpop.eup %827 }
 0x124   :  { %480 = vperm.xlu0 %815, %v1065_v49   ;;  %v1068_v52 = vpop.eup %829 }
 0x125   :  { %v1071_v54 = vpop.eup %831 }
 0x126   :  { %v1073_v57 = vpop.eup %833 }
 0x127   :  { %v1077_v61 = vpop.eup %835 }
 0x128   :  { %v1080_v62 = vpop.eup %837 }
 0x129   :  { %356 = vperm.xlu1 %816, %v302_v30   ;;  %465 = vperm.xlu2 %814, %v1068_v52  }
 0x131   :  { %460 = vperm.xlu1 %816, %v1073_v57   ;;  %485 = vperm.xlu2 %814, %v1071_v54  }
 0x139   :  { %475 = vperm.xlu1 %816, %v1077_v61  }
 0x141   :  { %490 = vperm.xlu1 %816, %v1080_v62  }
 0x163   :  { %v342_v9 = vpop.permute.xlu2 %341 }
 0x164   :  { %v371_v10 = vsub.f32 %v983_v40, %v342_v9  ;;  %v518_v40 = vld [vmem:[%s1213_s2 + $0x10] sm:$0xf] }
 0x166   :  { %v381_v11 = vmul.f32 1.442695, %v371_v10 }
 0x168   :  { %839 = vpow2.f32 %v381_v11 }
 0x16b   :  { %v337_v12 = vpop.permute.xlu2 %336 }
 0x16c   :  { %v370_v13 = vsub.f32 %v979_v37, %v337_v12  ;;  %v603_v37 = vsel %vm525_vm2, %v518_v40, 0  ;;  %v327_v12 = vmul.f32 1.442695, %v312_v47  ;;  %v394_v47 = vld [vmem:[#allocation3 + $0x8] sm:$0xff] }
 0x16d   :  { %612 = vmatpush.bf16.msrb.mxu0 %v603_v37  ;;  %v402_v37 = vmul.f32 %v1068_v52, %v394_v47 }
 0x16e   :  { %v840_v15 = vpop.eup %839  ;;  %v379_v16 = vmul.f32 1.442695, %v370_v13 }
 0x16f   :  { %v508_v18 = vpack.c.bf16 %v840_v15, %v840_v15  ;;  %v415_v19 = vsel %vm39_vm0, %v840_v15, 0.0 }
 0x170   :  { %841 = vpow2.f32 %v379_v16  ;;  %416 = vadd.xlane.f32.xlu1 %v415_v19 }
 0x171   :  { %805 = vmatmul.msk.bf16.vlgmr.msra.gmra.mxu2 %vm39_vm0, %v508_v18  ;;  %v403_v18 = vmul.f32 %v1050_v35, %v395_v17  ;;  %v393_v35 = vld [vmem:[#allocation3] sm:$0xff] }
 0x173   :  { %v362_v20 = vpop.permute.xlu2 %361 }
 0x174   :  { %v375_v21 = vsub.f32 %v1016_v0, %v362_v20  ;;  %v521_v0 = vld [vmem:[%s1213_s2 + $0x1c] sm:$0xf] }
 0x175   :  { %v332_v22 = vpop.permute.xlu1 %331 }
 0x176   :  { %v842_v23 = vpop.eup %841  ;;  %v389_v24 = vmul.f32 1.442695, %v375_v21  ;;  %v369_v25 = vsub.f32 %v968_v27, %v332_v22  ;;  %v660_v27 = vsel %vm525_vm2, %v521_v0, 0 }
 0x177   :  { %v507_v26 = vpack.c.bf16 %v842_v23, %v842_v23  ;;  %v412_v28 = vsel %vm39_vm0, %v842_v23, 0.0  ;;  %669 = vmatpush.bf16.msrb.mxu3 %v660_v27 }
 0x178   :  { %843 = vpow2.f32 %v389_v24  ;;  %v377_v29 = vmul.f32 1.442695, %v369_v25  ;;  %413 = vadd.xlane.f32.xlu2 %v412_v28  ;;  %v452_v24 = vld [vmem:[#allocation4 + $0x10] sm:$0xff]  ;;  %v451_v25 = vld [vmem:[#allocation4 + $0x8] sm:$0xff] }
 0x179   :  { %804 = vmatmul.msk.bf16.vlgmr.msra.gmra.mxu1 %vm39_vm0, %v507_v26 }
 0x17a   :  { %845 = vpow2.f32 %v377_v29 }
 0x17b   :  { %v352_v30 = vpop.permute.xlu2 %351 }
 0x17c   :  { %v373_v31 = vsub.f32 %v1010_v56, %v352_v30  ;;  %v401_v30 = vmul.f32 %v1073_v57, %v393_v35 }
 0x17e   :  { %v844_v32 = vpop.eup %843  ;;  %v385_v33 = vmul.f32 1.442695, %v373_v31 }
 0x17f   :  { %v512_v34 = vpack.c.bf16 %v844_v32, %v844_v32  ;;  %v427_v2 = vsel %vm39_vm0, %v844_v32, 0.0 }
 0x180   :  { %v846_v36 = vpop.eup %845  ;;  %847 = vpow2.f32 %v385_v33 }
 0x181   :  { %v506_v38 = vpack.c.bf16 %v846_v36, %v846_v36  ;;  %809 = vmatmul.msk.bf16.vlgmr.msrb.gmra.mxu2 %vm39_vm0, %v512_v34  ;;  %v409_v39 = vsel %vm39_vm0, %v846_v36, 0.0  ;;  %v397_v36 = vld [vmem:[#allocation3 + $0x20] sm:$0xff] }
 0x182   :  { %410 = vadd.xlane.f32.xlu0 %v409_v39  ;;  %v450_v39 = vld [vmem:[#allocation4] sm:$0xff]  ;;  %v405_v57 = vmul.f32 %v1065_v49, %v397_v36 }
 0x183   :  { %803 = vmatmul.msk.bf16.vlgmr.msra.gmra.mxu0 %vm39_vm0, %v506_v38  ;;  %v347_v56 = vpop.permute.xlu0 %346  ;;  %v466_v15 = vpop.permute.xlu2 %465 }
 0x184   :  { %v372_v42 = vsub.f32 %v996_v45, %v347_v56  ;;  %v499_v31 = vmul.f32 %v466_v15, %v451_v25  ;;  %v400_v15 = vld [vmem:[#allocation3 + $0x38] sm:$0xff] }
 0x186   :  { %v848_v46 = vpop.eup %847  ;;  %v383_v48 = vmul.f32 1.442695, %v372_v42 }
 0x187   :  { %v421_v51 = vsel %vm39_vm0, %v848_v46, 0.0  ;;  %v510_v60 = vpack.c.bf16 %v848_v46, %v848_v46 }
 0x188   :  { %849 = vpow2.f32 %v383_v48 }
 0x18a   :  { %422 = vadd.xlane.f32.xlu0 %v421_v51 }
 0x18b   :  { %v1148_v19 = vpop.permute.xlu2 %485  ;;  %v471_v44 = vpop.permute.xlu0 %470 }
 0x18c   :  { %v500_v26 = vmul.f32 %v471_v44, %v452_v24 }
 0x18e   :  { %v850_v53 = vpop.eup %849 }
 0x18f   :  { %v509_v55 = vpack.c.bf16 %v850_v53, %v850_v53  ;;  %v418_v59 = vsel %vm39_vm0, %v850_v53, 0.0  ;;  %v456_v53 = vld [vmem:[#allocation4 + $0x30] sm:$0xff] }
 0x190   :  { %419 = vadd.xlane.f32.xlu2 %v418_v59 }
 0x191   :  { %806 = vmatmul.msk.bf16.vlgmr.msra.gmra.mxu3 %vm39_vm0, %v509_v55 }
 0x193   :  { %v367_v45 = vpop.permute.xlu1 %366  ;;  %807 = vmatmul.msk.bf16.vlgmr.msrb.gmra.mxu0 %vm39_vm0, %v510_v60  ;;  %v404_v60 = vmul.f32 %v1077_v61, %v396_v50 }
 0x194   :  { %v376_v63 = vsub.f32 %v1025_v5, %v367_v45 }
 0x196   :  { %v391_v1 = vmul.f32 1.442695, %v376_v63  ;;  %v1152_v22 = vpop.permute.xlu0 %480 }
 0x198   :  { %851 = vpow2.f32 %v391_v1  ;;  %428 = vadd.xlane.f32.xlu2 %v427_v2 }
 0x19b   :  { %v357_v3 = vpop.permute.xlu1 %356 }
 0x19c   :  { %v374_v4 = vsub.f32 %v1012_v58, %v357_v3 }
 0x19e   :  { %v852_v6 = vpop.eup %851  ;;  %v387_v7 = vmul.f32 1.442695, %v374_v4  ;;  %v399_v4 = vld [vmem:[#allocation3 + $0x30] sm:$0xff] }
 0x19f   :  { %v513_v8 = vpack.c.bf16 %v852_v6, %v852_v6  ;;  %v430_v9 = vsel %vm39_vm0, %v852_v6, 0.0 }
 0x1a0   :  { %853 = vpow2.f32 %v387_v7  ;;  %431 = vadd.xlane.f32.xlu0 %v430_v9  ;;  %v454_v9 = vld [vmem:[#allocation4 + $0x20] sm:$0xff] }
 0x1a1   :  { %810 = vmatmul.msk.bf16.vlgmr.msrb.gmra.mxu3 %vm39_vm0, %v513_v8  ;;  %855 = vpow2.f32 %v327_v12  ;;  %v407_v8 = vmul.f32 %v1080_v62, %v399_v4 }
 0x1a3   :  { %v461_v13 = vpop.permute.xlu1 %460 }
 0x1a4   :  { %v498_v48 = vmul.f32 %v461_v13, %v450_v39  ;;  %v502_v13 = vmul.f32 %v1152_v22, %v454_v9  ;;  %v398_v22 = vld [vmem:[#allocation3 + $0x28] sm:$0xff] }
 0x1a6   :  { %v854_v10 = vpop.eup %853 }
 0x1a7   :  { %v511_v11 = vpack.c.bf16 %v854_v10, %v854_v10  ;;  %v424_v5 = vsel %vm39_vm0, %v854_v10, 0.0  ;;  %v1142_v58 = vpop.eup %855 }
 0x1a8   :  { %425 = vadd.xlane.f32.xlu1 %v424_v5 }
 0x1a9   :  { %808 = vmatmul.msk.bf16.vlgmr.msrb.gmra.mxu1 %vm39_vm0, %v511_v11 }
 0x1ab   :  { %v1145_v14 = vpop.permute.xlu1 %475 }
 0x1b3   :  { %v491_v16 = vpop.permute.xlu1 %490 }
 0x1b4   :  { %495 = vperm.xlu0 %815, %v1142_v58   ;;  %v504_v45 = vmul.f32 %v491_v16, %v456_v53  ;;  %v453_v16 = vld [vmem:[#allocation4 + $0x18] sm:$0xff] }
 0x1b5   :  { %v501_v62 = vmul.f32 %v1145_v14, %v453_v16 }
 0x1e3   :  { %v417_v40 = vpop.xlane.xlu1 %416 }
 0x1e4   :  { %v435_v41 = vadd.f32 %v417_v40, %v403_v18  ;;  %v408_v40 = vmul.f32 %v1142_v58, %v400_v15  ;;  %v406_v58 = vmul.f32 %v1071_v54, %v398_v22 }
 0x1e6   :  { %444 = vst.msk [vmem:[#allocation3 + $0x10] sm:$0xff] %vm22_vm1, %v435_v41 }
 0x1eb   :  { %v414_v20 = vpop.xlane.xlu2 %413 }
 0x1ec   :  { %v434_v21 = vadd.f32 %v414_v20, %v402_v37 }
 0x1ed   :  { %v712_v23 = vld [vmem:[#allocation3 + $0x10] sm:$0xff] }
 0x1ee   :  { %443 = vst.msk [vmem:[#allocation3 + $0x8] sm:$0xff] %vm22_vm1, %v434_v21  ;;  %857 = vrcp.f32 %v712_v23 }
 0x1f4   :  { %v858_v28 = vpop.eup %857  ;;  %v576_v29 = vpop.f32.mrf.mxu2 }
 0x1f5   :  { %v677_v0 = vadd.f32 %v576_v29, %v500_v26  ;;  %738 = vperm.xlu0 %815, %v858_v28   ;;  %v411_v52 = vpop.xlane.xlu0 %410  ;;  %v711_v32 = vld [vmem:[#allocation3 + $0x8] sm:$0xff] }
 0x1f6   :  { %v433_v33 = vadd.f32 %v411_v52, %v401_v30  ;;  %v557_v27 = vpop.f32.mrf.mxu1  ;;  %859 = vrcp.f32 %v711_v32  ;;  %v455_v28 = vld [vmem:[#allocation4 + $0x28] sm:$0xff] }
 0x1f7   :  { %685 = vst.msk [vmem:[#allocation4 + $0x10] sm:$0xff] %vm39_vm0, %v677_v0  ;;  %v676_v34 = vadd.f32 %v557_v27, %v499_v31  ;;  %v457_v31 = vld [vmem:[#allocation4 + $0x38] sm:$0xff]  ;;  %v503_v0 = vmul.f32 %v1148_v19, %v455_v28 }
 0x1f8   :  { %442 = vst.msk [vmem:[#allocation3] sm:$0xff] %vm22_vm1, %v433_v33 }
 0x1f9   :  { %684 = vst.msk [vmem:[#allocation4 + $0x8] sm:$0xff] %vm39_vm0, %v676_v34 }
 0x1fc   :  { %v860_v38 = vpop.eup %859  ;;  %v578_v56 = vpop.f32.mrf.mxu2 }
 0x1fd   :  { %733 = vperm.xlu1 %816, %v860_v38   ;;  %v423_v42 = vpop.xlane.xlu0 %422 }
 0x1fe   :  { %v437_v43 = vadd.f32 %v423_v42, %v405_v57  ;;  %v559_v46 = vpop.f32.mrf.mxu1 }
 0x1ff   :  { %v710_v51 = vld [vmem:[#allocation3] sm:$0xff] }
 0x200   :  { %446 = vst.msk [vmem:[#allocation3 + $0x20] sm:$0xff] %vm22_vm1, %v437_v43  ;;  %v538_v55 = vpop.f32.mrf.mxu0  ;;  %861 = vrcp.f32 %v710_v51  ;;  %v704_v43 = vld [vmem:[#allocation4 + $0x10] sm:$0xff]  ;;  %v703_v51 = vld [vmem:[#allocation4 + $0x8] sm:$0xff] }
 0x201   :  { %v675_v59 = vadd.f32 %v538_v55, %v498_v48 }
 0x203   :  { %683 = vst.msk [vmem:[#allocation4] sm:$0xff] %vm39_vm0, %v675_v59  ;;  %v420_v63 = vpop.xlane.xlu2 %419 }
 0x204   :  { %v436_v49 = vadd.f32 %v420_v63, %v404_v60  ;;  %v652_v1 = vpop.f32.mrf.mxu2 }
 0x205   :  { %v681_v2 = vadd.f32 %v652_v1, %v504_v45 }
 0x206   :  { %v862_v3 = vpop.eup %861  ;;  %445 = vst.msk [vmem:[#allocation3 + $0x18] sm:$0xff] %vm22_vm1, %v436_v49 }
 0x207   :  { %689 = vst.msk [vmem:[#allocation4 + $0x30] sm:$0xff] %vm39_vm0, %v681_v2  ;;  %728 = vperm.xlu2 %814, %v862_v3   ;;  %v714_v6 = vld [vmem:[#allocation3 + $0x20] sm:$0xff] }
 0x208   :  { %v540_v7 = vpop.f32.mrf.mxu0  ;;  %863 = vrcp.f32 %v714_v6 }
 0x20a   :  { %v702_v57 = vld [vmem:[#allocation4] sm:$0xff] }
 0x20b   :  { %v429_v61 = vpop.xlane.xlu2 %428 }
 0x20c   :  { %v439_v10 = vadd.f32 %v429_v61, %v407_v8  ;;  %v654_v11 = vpop.f32.mrf.mxu2 }
 0x20d   :  { %v713_v5 = vld [vmem:[#allocation3 + $0x18] sm:$0xff] }
 0x20e   :  { %v864_v12 = vpop.eup %863  ;;  %448 = vst.msk [vmem:[#allocation3 + $0x30] sm:$0xff] %vm22_vm1, %v439_v10  ;;  %865 = vrcp.f32 %v713_v5  ;;  %v708_v1 = vld [vmem:[#allocation4 + $0x30] sm:$0xff] }
 0x20f   :  { %748 = vperm.xlu1 %816, %v864_v12  }
 0x210   :  { %v614_v17 = vpop.f32.mrf.mxu0 }
 0x211   :  { %v679_v18 = vadd.f32 %v614_v17, %v502_v13 }
 0x213   :  { %687 = vst.msk [vmem:[#allocation4 + $0x20] sm:$0xff] %vm39_vm0, %v679_v18  ;;  %v432_v41 = vpop.xlane.xlu0 %431 }
 0x214   :  { %v866_v44 = vpop.eup %865  ;;  %v440_v47 = vadd.f32 %v432_v41, %v408_v40  ;;  %v595_v37 = vpop.f32.mrf.mxu3 }
 0x215   :  { %v678_v20 = vadd.f32 %v595_v37, %v501_v62  ;;  %743 = vperm.xlu2 %814, %v866_v44   ;;  %v716_v21 = vld [vmem:[#allocation3 + $0x30] sm:$0xff] }
 0x216   :  { %449 = vst.msk [vmem:[#allocation3 + $0x38] sm:$0xff] %vm22_vm1, %v440_v47  ;;  %867 = vrcp.f32 %v716_v21 }
 0x217   :  { %686 = vst.msk [vmem:[#allocation4 + $0x18] sm:$0xff] %vm39_vm0, %v678_v20 }
 0x218   :  { %v616_v23 = vpop.f32.mrf.mxu0 }
 0x21a   :  { %v706_v7 = vld [vmem:[#allocation4 + $0x20] sm:$0xff] }
 0x21b   :  { %v426_v24 = vpop.xlane.xlu1 %425 }
 0x21c   :  { %v868_v14 = vpop.eup %867  ;;  %v438_v35 = vadd.f32 %v426_v24, %v406_v58  ;;  %v597_v25 = vpop.f32.mrf.mxu3 }
 0x21d   :  { %758 = vperm.xlu2 %814, %v868_v14   ;;  %v717_v26 = vld [vmem:[#allocation3 + $0x38] sm:$0xff] }
 0x21e   :  { %447 = vst.msk [vmem:[#allocation3 + $0x28] sm:$0xff] %vm22_vm1, %v438_v35  ;;  %869 = vrcp.f32 %v717_v26  ;;  %v705_v55 = vld [vmem:[#allocation4 + $0x18] sm:$0xff] }
 0x224   :  { %v870_v29 = vpop.eup %869  ;;  %v671_v30 = vpop.f32.mrf.mxu3 }
 0x225   :  { %763 = vperm.xlu1 %816, %v870_v29   ;;  %v715_v52 = vld [vmem:[#allocation3 + $0x28] sm:$0xff] }
 0x226   :  { %v633_v32 = vpop.f32.mrf.mxu1  ;;  %v496_v33 = vpop.permute.xlu0 %495  ;;  %871 = vrcp.f32 %v715_v52 }
 0x227   :  { %v680_v54 = vadd.f32 %v633_v32, %v503_v0  ;;  %v505_v27 = vmul.f32 %v496_v33, %v457_v31 }
 0x229   :  { %688 = vst.msk [vmem:[#allocation4 + $0x28] sm:$0xff] %vm39_vm0, %v680_v54  ;;  %v682_v34 = vadd.f32 %v671_v30, %v505_v27 }
 0x22b   :  { %690 = vst.msk [vmem:[#allocation4 + $0x38] sm:$0xff] %vm39_vm0, %v682_v34 }
 0x22c   :  { %v872_v36 = vpop.eup %871  ;;  %v673_v38 = vpop.f32.mrf.mxu3 }
 0x22d   :  { %753 = vperm.xlu0 %815, %v872_v36  }
 0x22e   :  { %v635_v39 = vpop.f32.mrf.mxu1 }
 0x230   :  { %v707_v12 = vld [vmem:[#allocation4 + $0x28] sm:$0xff] }
 0x232   :  { %v709_v10 = vld [vmem:[#allocation4 + $0x38] sm:$0xff] }
 0x261   :  { %v729_v56 = vpop.permute.xlu2 %728 }
 0x262   :  { %v766_v42 = vmul.f32 %v729_v56, %v702_v57 }
 0x264   :  { %v774_v19 = vpack.c.bf16 %v766_v42, %v766_v42 }
 0x266   :  { %783 = vst.msk [vmem:[%s1214_s4] sm:$0xf] %vm782_vm3, %v774_v19 }
 0x267   :  { %v739_v46 = vpop.permute.xlu0 %738 }
 0x268   :  { %v768_v48 = vmul.f32 %v739_v46, %v704_v43 }
 0x26a   :  { %v776_v50 = vpack.c.bf16 %v768_v48, %v768_v48 }
 0x26c   :  { %785 = vst.msk [vmem:[%s1214_s4 + $0x8] sm:$0xf] %vm782_vm3, %v776_v50 }
 0x26f   :  { %v734_v53 = vpop.permute.xlu1 %733  ;;  %v744_v59 = vpop.permute.xlu2 %743 }
 0x270   :  { %v767_v60 = vmul.f32 %v734_v53, %v703_v51  ;;  %v769_v45 = vmul.f32 %v744_v59, %v705_v55 }
 0x272   :  { %v775_v63 = vpack.c.bf16 %v767_v60, %v767_v60  ;;  %v777_v49 = vpack.c.bf16 %v769_v45, %v769_v45 }
 0x274   :  { %784 = vst.msk [vmem:[%s1214_s4 + $0x4] sm:$0xf] %vm782_vm3, %v775_v63 }
 0x275   :  { %786 = vst.msk [vmem:[%s1214_s4 + $0xc] sm:$0xf] %vm782_vm3, %v777_v49 }
 0x277   :  { %v759_v2 = vpop.permute.xlu2 %758 }
 0x278   :  { %v772_v3 = vmul.f32 %v759_v2, %v708_v1 }
 0x27a   :  { %v780_v4 = vpack.c.bf16 %v772_v3, %v772_v3 }
 0x27c   :  { %789 = vst.msk [vmem:[%s1214_s4 + $0x18] sm:$0xf] %vm782_vm3, %v780_v4 }
 0x281   :  { %v749_v6 = vpop.permute.xlu1 %748 }
 0x282   :  { %v770_v8 = vmul.f32 %v749_v6, %v706_v7 }
 0x284   :  { %v778_v61 = vpack.c.bf16 %v770_v8, %v770_v8 }
 0x286   :  { %787 = vst.msk [vmem:[%s1214_s4 + $0x10] sm:$0xf] %vm782_vm3, %v778_v61 }
 0x297   :  { %v764_v9 = vpop.permute.xlu1 %763 }
 0x298   :  { %v773_v11 = vmul.f32 %v764_v9, %v709_v10 }
 0x29a   :  { %v781_v5 = vpack.c.bf16 %v773_v11, %v773_v11 }
 0x29c   :  { %790 = vst.msk [vmem:[%s1214_s4 + $0x1c] sm:$0xf] %vm782_vm3, %v781_v5 }
 0x29f   :  { %v754_v13 = vpop.permute.xlu0 %753 }
 0x2a0   :  { %v771_v15 = vmul.f32 %v754_v13, %v707_v12 }
 0x2a2   :  { %v779_v16 = vpack.c.bf16 %v771_v15, %v771_v15 }
 0x2a4   :  { %788 = vst.msk [vmem:[%s1214_s4 + $0x14] sm:$0xf] %vm782_vm3, %v779_v16 }

// kernel: _logits_fn.16
= control target key start
LH: loop header
LB: loop body
LE: loop exit
PB: predicated region body
PF: predicated region fallthrough
CT: control target
= control target key end

     0   :  { %vm19_vm0 = vcmask 523264   ;;  %v130_v1 = vmov 0.0   ;;  %vm47_vm1 = vcmask 261120   ;;  %vm101_vm2 = vcmask 519168   ;;  %s173_s1 = inlined_call_operand.vmem [shape: bf16[32,64], index: 1, kind: input, shape index: {}]   ;;  %s174_s2 = inlined_call_operand.vmem [shape: f32[1,64], index: 2, kind: input, shape index: {}]   ;;  %s175_s0 = inlined_call_operand.vmem [shape: bf16[16,32], index: 0, kind: input, shape index: {}]   ;;  %s176_s3 = inlined_call_operand.vmem [shape: bf16[16,64], index: 3, kind: output, shape index: {}]  }
   0x1   :  { %v123_v0 = vld [vmem:[%s173_s1 + $0x8] sm:$0xff]  ;;  %20 = vst.msk [vmem:[#allocation2] sm:$0xff] %vm19_vm0, %v130_v1  ;;  %v122_v2 = vld [vmem:[%s173_s1] sm:$0xff] }
   0x2   :  { %21 = vst.msk [vmem:[#allocation2 + $0x8] sm:$0xff] %vm19_vm0, %v130_v1  ;;  %57 = vmatpush.bf16.msra.mxu0 %v123_v0  ;;  %v121_v3 = vld [vmem:[%s175_s0] sm:$0xff] }
   0x3   :  { %v125_v8 = vld [vmem:[%s174_s2] ss:$0 sm:$0xff] }
   0x6   :  { %58 = vmatpush.bf16.msra.mxu0 %v122_v2 }
   0x8   :  { %v22_v4 = vld [vmem:[#allocation2] sm:$0xff] }
   0x9   :  { %120 = vmatmul.msk.bf16.vlgmr.msra.gmra.mxu0 %vm47_vm1, %v121_v3  ;;  %v23_v7 = vld [vmem:[#allocation2 + $0x8] sm:$0xff] }
  0x86   :  { %v60_v5 = vpop.f32.mrf.mxu0 }
  0x87   :  { %v65_v6 = vadd.f32 %v60_v5, %v22_v4 }
  0x89   :  { %68 = vst.msk [vmem:[#allocation2] sm:$0xff] %vm19_vm0, %v65_v6 }
  0x8e   :  { %v62_v9 = vpop.f32.mrf.mxu0 }
  0x8f   :  { %v66_v10 = vadd.f32 %v62_v9, %v23_v7 }
  0x90   :  { %v73_v11 = vld [vmem:[#allocation2] sm:$0xff] }
  0x91   :  { %v79_v12 = vadd.f32 %v125_v8, %v73_v11  ;;  %69 = vst.msk [vmem:[#allocation2 + $0x8] sm:$0xff] %vm19_vm0, %v66_v10 }
  0x93   :  { %v83_v13 = vmul.f32 0.044715, %v79_v12  ;;  %v81_v26 = vmul.f32 0.5, %v79_v12 }
  0x95   :  { %v85_v14 = vmul.f32 %v83_v13, %v79_v12 }
  0x97   :  { %v87_v15 = vmul.f32 %v85_v14, %v79_v12 }
  0x98   :  { %v74_v16 = vld [vmem:[#allocation2 + $0x8] sm:$0xff] }
  0x99   :  { %v89_v17 = vadd.f32 %v87_v15, %v79_v12  ;;  %v80_v18 = vadd.f32 %v125_v8, %v74_v16 }
  0x9b   :  { %v91_v19 = vmul.f32 0.7978846, %v89_v17  ;;  %v84_v20 = vmul.f32 0.044715, %v80_v18  ;;  %v82_v31 = vmul.f32 0.5, %v80_v18 }
  0x9d   :  { %126 = vtanh.f32 %v91_v19  ;;  %v86_v21 = vmul.f32 %v84_v20, %v80_v18 }
  0x9f   :  { %v88_v22 = vmul.f32 %v86_v21, %v80_v18 }
  0xa1   :  { %v90_v23 = vadd.f32 %v88_v22, %v80_v18 }
  0xa3   :  { %v127_v24 = vpop.eup %126  ;;  %v92_v25 = vmul.f32 0.7978846, %v90_v23 }
  0xa4   :  { %v95_v27 = vadd.f32 1.0, %v127_v24 }
  0xa5   :  { %128 = vtanh.f32 %v92_v25 }
  0xa6   :  { %v97_v28 = vmul.f32 %v95_v27, %v81_v26 }
  0xa8   :  { %v99_v29 = vpack.c.bf16 %v97_v28, %v97_v28 }
  0xaa   :  { %102 = vst.msk [vmem:[%s176_s3] sm:$0xf] %vm101_vm2, %v99_v29 }
  0xab   :  { %v129_v30 = vpop.eup %128 }
  0xac   :  { %v96_v32 = vadd.f32 1.0, %v129_v30 }
  0xae   :  { %v98_v33 = vmul.f32 %v96_v32, %v82_v31 }
  0xb0   :  { %v100_v34 = vpack.c.bf16 %v98_v33, %v98_v33 }
  0xb2   :  { %103 = vst.msk [vmem:[%s176_s3 + $0x4] sm:$0xf] %vm101_vm2, %v100_v34 }

// kernel: _logits_fn.17
= control target key start
LH: loop header
LB: loop body
LE: loop exit
PB: predicated region body
PF: predicated region fallthrough
CT: control target
= control target key end

     0   :  { %vm28_vm0 = vcmask 261120   ;;  %v216_v1 = vmov 0.0   ;;  %vm72_vm1 = vcmask 523264   ;;  %v217_v23 = vmov 32.0   ;;  %s299_s1 = inlined_call_operand.vmem [shape: bf16[64,32], index: 1, kind: input, shape index: {}]   ;;  %s300_s0 = inlined_call_operand.vmem [shape: bf16[16,64], index: 0, kind: input, shape index: {}]   ;;  %s301_s2 = inlined_call_operand.vmem [shape: f32[1,32], index: 2, kind: input, shape index: {}]   ;;  %s302_s3 = inlined_call_operand.vmem [shape: f32[16,32], index: 3, kind: input, shape index: {}]   ;;  %s303_s4 = inlined_call_operand.vmem [shape: f32[1,32], index: 4, kind: input, shape index: {}]   ;;  %s304_s5 = inlined_call_operand.vmem [shape: f32[1,32], index: 5, kind: input, shape index: {}]   ;;  %s305_s6 = inlined_call_operand.vmem [shape: f32[16,32], index: 6, kind: output, shape index: {}]  }
   0x1   :  { %v204_v0 = vld [vmem:[%s299_s1 + $0x18] sm:$0xff]  ;;  %29 = vst.msk [vmem:[#allocation2] sm:$0xff] %vm28_vm0, %v216_v1  ;;  %v203_v2 = vld [vmem:[%s299_s1 + $0x10] sm:$0xff]  ;;  %v202_v3 = vld [vmem:[%s299_s1 + $0x8] sm:$0xff]  ;;  %210 = vrcp.f32 %v217_v23 }
   0x2   :  { %30 = vst.msk [vmem:[#allocation2 + $0x8] sm:$0xff] %vm28_vm0, %v216_v1  ;;  %80 = vmatpush.bf16.msra.mxu0 %v204_v0  ;;  %v201_v4 = vld [vmem:[%s299_s1] sm:$0xff]  ;;  %v107_v19 = vld [vmem:[%s302_s3 + $0x8] sm:$0xff] }
   0x3   :  { %v200_v5 = vld [vmem:[%s300_s0] sm:$0xff] }
   0x4   :  { %v207_v10 = vld [vmem:[%s301_s2] ss:$0 sm:$0xff] }
   0x5   :  { %v106_v14 = vld [vmem:[%s302_s3] sm:$0xff] }
   0x6   :  { %81 = vmatpush.bf16.msra.mxu0 %v203_v2  ;;  %v208_v54 = vld [vmem:[%s303_s4] ss:$0 sm:$0xff] }
   0x7   :  { %v211_v24 = vpop.eup %210  ;;  %v209_v57 = vld [vmem:[%s304_s5] ss:$0 sm:$0xff] }
   0x8   :  { %v31_v6 = vld [vmem:[#allocation2] sm:$0xff]  ;;  %v117_v25 = vmul.f32 32.0, %v211_v24  ;;  %vm121_vm2 = vweird.f32 %v211_v24 }
   0x9   :  { %v32_v9 = vld [vmem:[#allocation2 + $0x8] sm:$0xff] }
   0xa   :  { %82 = vmatpush.bf16.msra.mxu0 %v202_v3  ;;  %v118_v26 = vsub.f32 1.0, %v117_v25 }
   0xc   :  { %v119_v27 = vmul.f32 %v211_v24, %v118_v26 }
   0xe   :  { %83 = vmatpush.bf16.msra.mxu0 %v201_v4  ;;  %v120_v28 = vadd.f32 %v211_v24, %v119_v27 }
  0x10   :  { %v122_v29 = vsel %vm121_vm2, %v211_v24, %v120_v28 }
  0x11   :  { %199 = vmatmul.msk.bf16.vlgmr.msra.gmra.mxu0 %vm72_vm1, %v200_v5 }
  0x8e   :  { %v85_v7 = vpop.f32.mrf.mxu0 }
  0x8f   :  { %v90_v8 = vadd.f32 %v85_v7, %v31_v6 }
  0x91   :  { %93 = vst.msk [vmem:[#allocation2] sm:$0xff] %vm28_vm0, %v90_v8 }
  0x96   :  { %v87_v11 = vpop.f32.mrf.mxu0 }
  0x97   :  { %v91_v12 = vadd.f32 %v87_v11, %v32_v9 }
  0x98   :  { %v98_v13 = vld [vmem:[#allocation2] sm:$0xff] }
  0x99   :  { %94 = vst.msk [vmem:[#allocation2 + $0x8] sm:$0xff] %vm28_vm0, %v91_v12  ;;  %v104_v15 = vadd.f32 %v207_v10, %v98_v13 }
  0x9b   :  { %v108_v16 = vadd.f32 %v106_v14, %v104_v15 }
  0x9d   :  { %v110_v17 = vsel %vm28_vm0, %v108_v16, 0.0 }
  0x9e   :  { %111 = vadd.xlane.f32.xlu0 %v110_v17 }
  0xa0   :  { %v99_v18 = vld [vmem:[#allocation2 + $0x8] sm:$0xff] }
  0xa1   :  { %v105_v20 = vadd.f32 %v207_v10, %v99_v18 }
  0xa3   :  { %v109_v21 = vadd.f32 %v107_v19, %v105_v20 }
  0xa5   :  { %v113_v22 = vsel %vm28_vm0, %v109_v21, 0.0 }
  0xa6   :  { %114 = vadd.xlane.f32.xlu0 %v113_v22 }
 0x111   :  { %v112_v30 = vpop.xlane.xlu0 %111 }
 0x112   :  { %v123_v31 = vmul.f32 %v122_v29, %v112_v30 }
 0x114   :  { %v125_v32 = vsub.f32 %v108_v16, %v123_v31 }
 0x116   :  { %v127_v33 = vmul.f32 %v125_v32, %v125_v32 }
 0x118   :  { %v129_v34 = vsel %vm28_vm0, %v127_v33, 0.0 }
 0x119   :  { %130 = vadd.xlane.f32.xlu1 %v129_v34  ;;  %v115_v35 = vpop.xlane.xlu0 %114 }
 0x11a   :  { %v124_v36 = vmul.f32 %v122_v29, %v115_v35 }
 0x11c   :  { %v126_v37 = vsub.f32 %v109_v21, %v124_v36 }
 0x11e   :  { %v128_v38 = vmul.f32 %v126_v37, %v126_v37 }
 0x120   :  { %v132_v39 = vsel %vm28_vm0, %v128_v38, 0.0 }
 0x121   :  { %133 = vadd.xlane.f32.xlu1 %v132_v39 }
 0x18c   :  { %v131_v40 = vpop.xlane.xlu1 %130 }
 0x18d   :  { %v135_v41 = vmul.f32 %v131_v40, %v122_v29 }
 0x18f   :  { %v137_v42 = vadd.f32 1e-12, %v135_v41 }
 0x191   :  { %212 = vrsqrt.f32 %v137_v42  ;;  %vm145_vm4 = vweird.f32 %v137_v42 }
 0x194   :  { %v134_v43 = vpop.xlane.xlu1 %133 }
 0x195   :  { %v136_v44 = vmul.f32 %v134_v43, %v122_v29 }
 0x197   :  { %v213_v45 = vpop.eup %212  ;;  %v138_v46 = vadd.f32 1e-12, %v136_v44 }
 0x198   :  { %v140_v47 = vmul.f32 %v213_v45, %v137_v42  ;;  %vm146_vm3 = vweird.f32 %v213_v45 }
 0x199   :  { %214 = vrsqrt.f32 %v138_v46  ;;  %vm147_vm5 = vmor %vm145_vm4, %vm146_vm3  ;;  %vm155_vm7 = vweird.f32 %v138_v46 }
 0x19a   :  { %v141_v48 = vmul.f32 %v213_v45, %v140_v47 }
 0x19c   :  { %v142_v49 = vmul.f32 0.5, %v141_v48 }
 0x19e   :  { %v143_v50 = vsub.f32 1.5, %v142_v49 }
 0x19f   :  { %v215_v51 = vpop.eup %214 }
 0x1a0   :  { %v144_v52 = vmul.f32 %v213_v45, %v143_v50  ;;  %v150_v53 = vmul.f32 %v215_v51, %v138_v46  ;;  %vm156_vm6 = vweird.f32 %v215_v51 }
 0x1a1   :  { %vm157_vm8 = vmor %vm155_vm7, %vm156_vm6 }
 0x1a2   :  { %v148_v55 = vsel %vm147_vm5, %v213_v45, %v144_v52  ;;  %v151_v56 = vmul.f32 %v215_v51, %v150_v53 }
 0x1a3   :  { %v159_v58 = vmul.f32 %v148_v55, %v125_v32 }
 0x1a4   :  { %v152_v59 = vmul.f32 0.5, %v151_v56 }
 0x1a5   :  { %v165_v60 = vmul.f32 %v208_v54, %v159_v58 }
 0x1a6   :  { %v153_v61 = vsub.f32 1.5, %v152_v59 }
 0x1a7   :  { %v171_v62 = vadd.f32 %v209_v57, %v165_v60 }
 0x1a8   :  { %v154_v63 = vmul.f32 %v215_v51, %v153_v61 }
 0x1a9   :  { %173 = vst.msk [vmem:[%s305_s6] sm:$0xff] %vm28_vm0, %v171_v62 }
 0x1aa   :  { %v158_v0 = vsel %vm157_vm8, %v215_v51, %v154_v63 }
 0x1ab   :  { %v160_v1 = vmul.f32 %v158_v0, %v126_v37 }
 0x1ad   :  { %v166_v2 = vmul.f32 %v208_v54, %v160_v1 }
 0x1af   :  { %v172_v3 = vadd.f32 %v209_v57, %v166_v2 }
 0x1b1   :  { %174 = vst.msk [vmem:[%s305_s6 + $0x8] sm:$0xff] %vm28_vm0, %v172_v3 }

// kernel: _logits_fn.23
= control target key start
LH: loop header
LB: loop body
LE: loop exit
PB: predicated region body
PF: predicated region fallthrough
CT: control target
= control target key end

     0   :  { %s220_s0 = inlined_call_operand.vmem [shape: bf16[2,32], index: 0, kind: input, shape index: {}]   ;;  %s221_s1 = inlined_call_operand.vmem [shape: bf16[32,32], index: 1, kind: input, shape index: {}]   ;;  %s222_s2 = inlined_call_operand.vmem [shape: f32[1,32], index: 2, kind: input, shape index: {}]   ;;  %s223_s3 = inlined_call_operand.vmem [shape: bf16[32,128], index: 3, kind: input, shape index: {}]   ;;  %s224_s4 = inlined_call_operand.vmem [shape: f32[1,128], index: 4, kind: input, shape index: {}]   ;;  %s225_s5 = inlined_call_operand.hbm [shape: f32[2,128], index: 5, kind: output, shape index: {}]  }
   0x1   :  { %v133_v0 = vld [vmem:[%s221_s1 + $0x8] sm:$0xff]  ;;  %v132_v2 = vld [vmem:[%s221_s1] sm:$0xff] }
   0x2   :  { %v135_v1 = vld [vmem:[%s223_s3 + $0x8] sm:$0xff]  ;;  %53 = vmatpush.bf16.msra.mxu0 %v133_v0 }
   0x3   :  { %10 = vsyncpa [#allocation3], 0  ;;  %90 = vmatpush.bf16.msra.mxu1 %v135_v1  ;;  %v22_v3 = vld [vmem:[%s220_s0] sm:$0x1]  ;;  %vm43_vm0 = vcmask 261120   ;;  %s165_s0 = smov [#allocation2]  }
   0x4   :  { %v134_v4 = vld [vmem:[%s223_s3] sm:$0xff]  ;;  %s103_s6 = sshll.u32 %s165_s0, 4  ;;  %s105_s3 = sshll.u32 %s225_s5, 4  ;;  %s104_s6 = int_to_ptr.vmem [resolvable:$true] %s103_s6  ;;  %s106_s3 = int_to_ptr.hbm [resolvable:$true] %s105_s3 }
   0x5   :  { %v137_v5 = vld [vmem:[%s222_s2] ss:$0 sm:$0xff] }
   0x6   :  { %54 = vmatpush.bf16.msra.mxu0 %v132_v2  ;;  %v138_v10 = vld [vmem:[%s224_s4] ss:$0 sm:$0xff] }
   0x7   :  { %91 = vmatpush.bf16.msra.mxu1 %v134_v4 }
   0x9   :  { %122 = vmatmul.msk.bf16.vlgmr.msra.gmra.mxu0 %vm43_vm0, %v22_v3 }
  0x86   :  { %v56_v6 = vpop.f32.mrf.mxu0 }
  0x87   :  { %v57_v7 = vadd.f32 %v137_v5, %v56_v6 }
  0x89   :  { %v60_v8 = vpack.c.bf16 %v57_v7, %v57_v7 }
  0x8b   :  { %131 = vmatmul.msk.bf16.vlgmr.msra.gmra.mxu1 %vm43_vm0, %v60_v8 }
  0x8e   :  { %v58_v9 = vpop.f32.mrf.mxu0 }
 0x108   :  { %v93_v11 = vpop.f32.mrf.mxu1 }
 0x109   :  { %v94_v12 = vadd.f32 %v138_v10, %v93_v11 }
 0x10b   :  { %97 = vst [vmem:[#allocation2] sm:$0x3] %v94_v12 }
 0x10c   :  { %108 = dma.vmem_to_hbm [thread:$0]  %s104_s6, 32, %s106_s3, [#allocation3]  }
 0x110   :  { %v95_v13 = vpop.f32.mrf.mxu1 }
 0x111   :  { %163 = dma.done.wait [#allocation3], 32  }
 0x112   :  { %164 = vsyncadd [#allocation3], 4294967264 }
 0x113   :  { %113 = vsyncpa [#allocation3], 1 }

</bundles_post_ra>
